<compile_context>
chip_gen: v7x
topology: tpu7x:2x2x1
jax: 0.10.0
libtpu: 0.0.40
codegen_flags: <defaults>
</compile_context>

<pallas_src>
import jax
import jax.numpy as jnp
from jax.experimental import pallas as pl
from jax.experimental.pallas import tpu as pltpu

NBATCH = 8
NHIST = 7
NSTATE = 1 + NHIST
NN = NSTATE * NSTATE
SUBLANES = 8                 # batch is folded onto the 8 sublanes of a vreg
DEFAULT_LANE_BLOCK = 512     # lanes per grid step -> 8*512 = 4096 batch elems / step

# --- synthetic deterministic model constants (stand-ins for the base
#     InelasticModel / srate_fn / stress_fn / T_fn of pyoptmat) -------------
E0 = 1000.0      # Young's modulus at reference temperature
ALPHA = 1e-4     # temperature softening coefficient
AFLOW = 1e-3     # flow-rule prefactor
NEXP = 2.0       # flow-rule exponent-like scale
S0 = 100.0       # flow-rule stress normalization
BETA = 0.2       # mild rate sensitivity (makes Newton non-trivial)
SRATE0 = 1.0     # stress-rate amplitude   (srate_fn)
SAMP = 100.0     # stress amplitude        (stress_fn)
OMEGA = 0.7      # driving frequency
T0 = 300.0       # base temperature        (T_fn)
DT_AMP = 25.0    # temperature excursion
NEWTON_ITERS = 6  # TODO(synk): pyoptmat uses tolerance-based newton_raphson; fixed unrolled iteration count here

# constant-folded temperature path: E(t) = E0*(1 - ALPHA*T(t))
E_CONST = E0 * (1.0 - ALPHA * T0)
E_SIN = E0 * ALPHA * DT_AMP


def _stress_kernel(c_ref, t_ref, y_ref, ydot_ref, jflat_ref):
    # c_ref: SMEM (3, NSTATE), rows = [w, C, D] with slot 0 zeroed (stress-slot mask).
    # t_ref: (8, L); y_ref / ydot_ref: (NSTATE, 8, L); jflat_ref: (NSTATE^2, 8, L).
    t = t_ref[...]

    # driving signals: csr = srate_fn(t), cs = stress_fn(t), E = E(T_fn(t)) (folded)
    csr = SRATE0 * jnp.cos(OMEGA * t)
    cs = SAMP * jnp.sin(OMEGA * t)
    E = E_CONST - E_SIN * jnp.sin(0.5 * t)

    # Backstress X = sum_i w_i * h_i.  w_0 == 0, so the stress slot of y is
    # masked automatically (no need to materialize yp with yp[0] <- cs).
    X = c_ref[0, 1] * y_ref[1]
    for i in range(2, NSTATE):
        X = X + c_ref[0, i] * y_ref[i]

    # Flow-rule prefactors: base = A*sinh(arg), dbase_ds = A*(n/s0)*cosh(arg).
    # Both exponentials are exact: (ea - 1/ea) with an approximate reciprocal
    # cancels catastrophically near arg == 0 (cs ~= X), so it is not used here.
    arg = (NEXP / S0) * (cs - X)
    ea = jnp.exp(arg)
    ema = jnp.exp(-arg)
    base = (0.5 * AFLOW) * (ea - ema)
    dbase_ds = (0.5 * AFLOW * NEXP / S0) * (ea + ema)

    # --- Newton-Raphson: solve E*(erate - frate(erate)) - csr = 0 -----------
    # The approx reciprocal inside the loop is self-correcting (its error folds
    # into the next residual); the last step has R ~= 0 so its error is benign.
    erate = jnp.zeros_like(cs)            # erate_guess = zeros
    for _ in range(NEWTON_ITERS):
        th = jnp.tanh(erate)
        frate = base * (1.0 + BETA * th)
        dfl_de = base * (BETA * (1.0 - th * th))
        R = E * (erate - frate) - csr     # R = ydot[:,0] - csr
        Jn = E * (1.0 - dfl_de)           # J = Je[:,0]
        erate = erate - R * pl.reciprocal(Jn, approx=True)

    # --- final model evaluation at the converged strain rate -----------------
    th = jnp.tanh(erate)
    g = 1.0 + BETA * th
    frate = base * g
    dflow_derate = base * (BETA * (1.0 - th * th))
    dfs = dbase_ds * g                    # dflow/dstress

    # ydot: stress row <- erate (post-processing); history rows <- C_i*frate - D_i*h_i
    ydot_ref[0] = erate
    for i in range(1, NSTATE):
        ydot_ref[i] = c_ref[1, i] * frate - c_ref[2, i] * y_ref[i]

    # Post-processed Jacobian, flattened over (row, col): k = row*NSTATE + col.
    #   row 0:        J[0, j] = -E*dfs*w_j / Je0       (w_0 = 0 -> column 0 zero)
    #   rows i >= 1:  J[i, j] = -dfs*C_i*w_j - D_i*delta_ij
    # Built element-row by element-row (static unrolled loops, immediate stores)
    # so only a few (8, L) tiles are live at any time -- no (ns^2, B) expression.
    x = E * (1.0 - dflow_derate)                      # Je0
    r = pl.reciprocal(x, approx=True)
    inv_Je0 = r * (2.0 - x * r)                       # one NR refinement: ~f32 exact, EUP-only
    neg_r0 = -(E * dfs) * inv_Je0                     # row-0 scale
    neg_dfs = -dfs

    for j in range(NSTATE):                           # row 0 of J
        jflat_ref[j] = c_ref[0, j] * neg_r0
    for i in range(1, NSTATE):                        # rows 1..ns-1 of J
        scale_i = c_ref[1, i] * neg_dfs               # -dfs * C_i
        for j in range(NSTATE):
            v = c_ref[0, j] * scale_i                 # -dfs*C_i*w_j (w_0 = 0 -> col 0 zero)
            if j == i:
                v = v - c_ref[2, i]                   # -D_i on the diagonal
            jflat_ref[i * NSTATE + j] = v


def stress_based_model(t, y, w, C, D, *, lane_block=DEFAULT_LANE_BLOCK):
    """StressBasedModel.forward with batch-last (lane/sublane-dense) outputs.

    t: (nb, 1), y: (nb, nstate), w/C/D: (nhist,)
    returns ydot (nstate, nb), J (nstate, nstate, nb) -- batch-last, no host transpose.
    """
    nb, ns = y.shape
    assert ns == NSTATE and w.shape == (NHIST,)
    assert lane_block % 128 == 0
    nn = ns * ns
    f32 = jnp.float32

    # Batch folded onto (8 sublanes) x (L lanes): 8*L elements per grid step.
    # Clamp L for tiny batches so 8 elements are not padded out to thousands.
    need_lanes = -(-nb // SUBLANES)
    L = min(lane_block, max(128, ((need_lanes + 127) // 128) * 128))
    block_batch = SUBLANES * L
    nblk = -(-nb // block_batch)
    nbp = nblk * block_batch

    tP = jnp.zeros((nbp,), f32).at[:nb].set(t.reshape(nb).astype(f32))
    tP = tP.reshape(nblk * SUBLANES, L)
    yP = jnp.zeros((ns, nbp), f32).at[:, :nb].set(y.astype(f32).T)
    yP = yP.reshape(ns, nblk * SUBLANES, L)

    # single packed SMEM constant: rows [w, C, D], stress slot (index 0) zeroed
    z1 = jnp.zeros((1,), f32)
    consts = jnp.stack([jnp.concatenate([z1, w.astype(f32)]),
                        jnp.concatenate([z1, C.astype(f32)]),
                        jnp.concatenate([z1, D.astype(f32)])])      # (3, ns)

    t_spec = pl.BlockSpec((SUBLANES, L), lambda b: (b, 0))
    y_spec = pl.BlockSpec((ns, SUBLANES, L), lambda b: (0, b, 0))
    ydot_spec = pl.BlockSpec((ns, SUBLANES, L), lambda b: (0, b, 0))
    jflat_spec = pl.BlockSpec((nn, SUBLANES, L), lambda b: (0, b, 0))

    ydotP, jflatP = pl.pallas_call(
        _stress_kernel,
        grid=(nblk,),
        out_shape=(jax.ShapeDtypeStruct((ns, nblk * SUBLANES, L), f32),
                   jax.ShapeDtypeStruct((nn, nblk * SUBLANES, L), f32)),
        in_specs=[pl.BlockSpec(memory_space=pltpu.MemorySpace.SMEM),
                  t_spec, y_spec],
        out_specs=(ydot_spec, jflat_spec),
        # "parallel" lets the runtime shard the batch-block axis across TensorCores
        # (v7x).  Per-block VMEM is only a few hundred KB, so the default scoped
        # VMEM limit is ample on v5e/v6e/v7x; set vmem_limit_bytes explicitly only
        # when sweeping lane_block far beyond 2048 on v7x (64 MiB physical VMEM).
        compiler_params=pltpu.CompilerParams(dimension_semantics=("parallel",)),
    )(consts, tP, yP)

    ydot_bl = ydotP.reshape(ns, nbp)[:, :nb]                          # (ns, nb)
    J_bl = jflatP.reshape(nn, nbp)[:, :nb].reshape(ns, ns, nb)        # (ns, ns, nb)
    return ydot_bl, J_bl


def stress_based_model_torch_layout(t, y, w, C, D, **kw):
    """Layout-compatible with the PyTorch module: ydot (nb, ns), J (nb, ns, ns).
    Prefer the batch-last outputs of stress_based_model on the hot path -- this
    transpose re-streams the full Jacobian through HBM."""
    ydot_bl, J_bl = stress_based_model(t, y, w, C, D, **kw)
    return ydot_bl.T, jnp.moveaxis(J_bl, -1, 0)


def reference(t, y, w, C, D):
    """Pure-JAX reference mirroring the PyTorch StressBasedModel.forward."""
    nb, ns = y.shape
    f32 = jnp.float32
    z1 = jnp.zeros((1,), f32)
    wfull = jnp.concatenate([z1, w.astype(f32)])[None, :]
    Cfull = jnp.concatenate([z1, C.astype(f32)])[None, :]
    Dfull = jnp.concatenate([z1, D.astype(f32)])[None, :]

    csr = SRATE0 * jnp.cos(OMEGA * t)
    cs = SAMP * jnp.sin(OMEGA * t)
    cT = T0 + DT_AMP * jnp.sin(0.5 * t)
    yp = y.at[:, 0:1].set(cs)
    E = E0 * (1.0 - ALPHA * cT)

    X = jnp.sum(yp * wfull, axis=1, keepdims=True)
    arg = NEXP * (cs - X) / S0
    base = AFLOW * jnp.sinh(arg)
    dbase_ds = AFLOW * (NEXP / S0) * jnp.cosh(arg)

    def flow(erate):
        th = jnp.tanh(erate)
        g = 1.0 + BETA * th
        return base * g, base * BETA * (1.0 - th * th), g

    erate = jnp.zeros_like(cs)
    for _ in range(NEWTON_ITERS):
        frate, dfl_de, _ = flow(erate)
        erate = erate - (E * (erate - frate) - csr) / (E * (1.0 - dfl_de))

    frate, dflow_derate, g = flow(erate)
    dflow_dstress = dbase_ds * g
    h, wv, Cv, Dv = yp[:, 1:], wfull[:, 1:], Cfull[:, 1:], Dfull[:, 1:]

    ydot = jnp.zeros((nb, ns), f32)
    ydot = ydot.at[:, 0:1].set(E * (erate - frate))
    ydot = ydot.at[:, 1:].set(Cv * frate - Dv * h)

    dflow_dhist = -dflow_dstress * wv
    dhist_dstress = Cv * dflow_dstress
    dd = (-dflow_dstress[:, :, None]
          * (Cv[0][None, :, None] * wv[0][None, None, :])
          - jnp.diag(Dv[0])[None, :, :])

    J = jnp.zeros((nb, ns, ns), f32)
    J = J.at[:, 0, 0].set((-E * dflow_dstress)[:, 0])
    J = J.at[:, 0, 1:].set(-E * dflow_dhist)
    J = J.at[:, 1:, 0].set(dhist_dstress)
    J = J.at[:, 1:, 1:].set(dd)

    Je0 = E * (1.0 - dflow_derate)
    J = J.at[:, 0, :].set(-J[:, 0, :] / Je0)
    J = J.at[:, :, 0].set(0.0)
    ydot = ydot.at[:, 0].set(erate[:, 0])
    return ydot, J


if __name__ == "__main__":
    key = jax.random.PRNGKey(0)
    t = jnp.linspace(0.1, 2.0, NBATCH, dtype=jnp.float32).reshape(NBATCH, 1)
    y = jax.random.normal(key, (NBATCH, NSTATE), dtype=jnp.float32)

    w = 0.10 + 0.05 * jnp.arange(NHIST, dtype=jnp.float32)
    C = 0.50 + 0.10 * jnp.arange(NHIST, dtype=jnp.float32)
    D = 0.05 + 0.02 * jnp.arange(NHIST, dtype=jnp.float32)

    # batch-last (hot-path) outputs
    ydot_bl, J_bl = stress_based_model(t, y, w, C, D)
    jax.block_until_ready((ydot_bl, J_bl))

    ydot_ref, J_ref = reference(t, y, w, C, D)
    assert jnp.allclose(ydot_bl.T, ydot_ref, rtol=1e-3, atol=1e-5), "ydot mismatch"
    assert jnp.allclose(jnp.moveaxis(J_bl, -1, 0), J_ref, rtol=1e-3, atol=1e-5), "Jacobian mismatch"

    # layout-compatible wrapper (matches the PyTorch module's return layout)
    ydot_t, J_t = stress_based_model_torch_layout(t, y, w, C, D)
    assert jnp.allclose(ydot_t, ydot_ref, rtol=1e-3, atol=1e-5), "ydot (torch layout) mismatch"
    assert jnp.allclose(J_t, J_ref, rtol=1e-3, atol=1e-5), "Jacobian (torch layout) mismatch"

    print("KERNEL_OK")
</pallas_src>

<mosaic_0001>
module attributes {stable_mosaic.version = 11 : i64} {
  func.func @_stress_kernel(%arg0: i32, %arg1: memref<3x8xf32, #tpu.memory_space<smem>>, %arg2: memref<8x128xf32, #tpu.memory_space<vmem>>, %arg3: memref<8x8x128xf32, #tpu.memory_space<vmem>>, %arg4: memref<8x8x128xf32, #tpu.memory_space<vmem>>, %arg5: memref<64x8x128xf32, #tpu.memory_space<vmem>>) attributes {dimension_semantics = [#tpu.dimension_semantics<parallel>], iteration_bounds = array<i64: 1>, scalar_prefetch = 0 : i64, scratch_operands = 0 : i64, tpu.core_type = #tpu.core_type<tc>, window_params = [{transform_indices = @transform_0, window_bounds = array<i64: 3, 8>}, {transform_indices = @transform_1, window_bounds = array<i64: 8, 128>}, {transform_indices = @transform_2, window_bounds = array<i64: 8, 8, 128>}, {transform_indices = @transform_3, window_bounds = array<i64: 8, 8, 128>}, {transform_indices = @transform_4, window_bounds = array<i64: 64, 8, 128>}]} {
    %c0 = arith.constant 0 : index
    %c0_0 = arith.constant 0 : index
    %0 = vector.load %arg2[%c0, %c0_0] : memref<8x128xf32, #tpu.memory_space<vmem>>, vector<8x128xf32>
    %cst = arith.constant 0.699999988 : f32
    %1 = vector.broadcast %cst : f32 to vector<8x128xf32>
    %2 = arith.mulf %1, %0 : vector<8x128xf32>
    %3 = math.cos %2 : vector<8x128xf32>
    %cst_1 = arith.constant 1.000000e+00 : f32
    %4 = vector.broadcast %cst_1 : f32 to vector<8x128xf32>
    %5 = arith.mulf %4, %3 : vector<8x128xf32>
    %cst_2 = arith.constant 0.699999988 : f32
    %6 = vector.broadcast %cst_2 : f32 to vector<8x128xf32>
    %7 = arith.mulf %6, %0 : vector<8x128xf32>
    %8 = math.sin %7 : vector<8x128xf32>
    %cst_3 = arith.constant 1.000000e+02 : f32
    %9 = vector.broadcast %cst_3 : f32 to vector<8x128xf32>
    %10 = arith.mulf %9, %8 : vector<8x128xf32>
    %cst_4 = arith.constant 5.000000e-01 : f32
    %11 = vector.broadcast %cst_4 : f32 to vector<8x128xf32>
    %12 = arith.mulf %11, %0 : vector<8x128xf32>
    %13 = math.sin %12 : vector<8x128xf32>
    %cst_5 = arith.constant 2.500000e+00 : f32
    %14 = vector.broadcast %cst_5 : f32 to vector<8x128xf32>
    %15 = arith.mulf %14, %13 : vector<8x128xf32>
    %cst_6 = arith.constant 9.700000e+02 : f32
    %16 = vector.broadcast %cst_6 : f32 to vector<8x128xf32>
    %17 = arith.subf %16, %15 : vector<8x128xf32>
    %c0_7 = arith.constant 0 : index
    %c1 = arith.constant 1 : index
    %18 = memref.load %arg1[%c0_7, %c1] : memref<3x8xf32, #tpu.memory_space<smem>>
    %c1_8 = arith.constant 1 : index
    %c0_9 = arith.constant 0 : index
    %c0_10 = arith.constant 0 : index
    %19 = vector.load %arg3[%c1_8, %c0_9, %c0_10] : memref<8x8x128xf32, #tpu.memory_space<vmem>>, vector<1x8x128xf32>
    %20 = vector.shape_cast %19 : vector<1x8x128xf32> to vector<8x128xf32>
    %21 = vector.broadcast %18 : f32 to vector<8x128xf32>
    %22 = arith.mulf %21, %20 : vector<8x128xf32>
    %c0_11 = arith.constant 0 : index
    %c2 = arith.constant 2 : index
    %23 = memref.load %arg1[%c0_11, %c2] : memref<3x8xf32, #tpu.memory_space<smem>>
    %c2_12 = arith.constant 2 : index
    %c0_13 = arith.constant 0 : index
    %c0_14 = arith.constant 0 : index
    %24 = vector.load %arg3[%c2_12, %c0_13, %c0_14] : memref<8x8x128xf32, #tpu.memory_space<vmem>>, vector<1x8x128xf32>
    %25 = vector.shape_cast %24 : vector<1x8x128xf32> to vector<8x128xf32>
    %26 = vector.broadcast %23 : f32 to vector<8x128xf32>
    %27 = arith.mulf %26, %25 : vector<8x128xf32>
    %28 = arith.addf %22, %27 : vector<8x128xf32>
    %c0_15 = arith.constant 0 : index
    %c3 = arith.constant 3 : index
    %29 = memref.load %arg1[%c0_15, %c3] : memref<3x8xf32, #tpu.memory_space<smem>>
    %c3_16 = arith.constant 3 : index
    %c0_17 = arith.constant 0 : index
    %c0_18 = arith.constant 0 : index
    %30 = vector.load %arg3[%c3_16, %c0_17, %c0_18] : memref<8x8x128xf32, #tpu.memory_space<vmem>>, vector<1x8x128xf32>
    %31 = vector.shape_cast %30 : vector<1x8x128xf32> to vector<8x128xf32>
    %32 = vector.broadcast %29 : f32 to vector<8x128xf32>
    %33 = arith.mulf %32, %31 : vector<8x128xf32>
    %34 = arith.addf %28, %33 : vector<8x128xf32>
    %c0_19 = arith.constant 0 : index
    %c4 = arith.constant 4 : index
    %35 = memref.load %arg1[%c0_19, %c4] : memref<3x8xf32, #tpu.memory_space<smem>>
    %c4_20 = arith.constant 4 : index
    %c0_21 = arith.constant 0 : index
    %c0_22 = arith.constant 0 : index
    %36 = vector.load %arg3[%c4_20, %c0_21, %c0_22] : memref<8x8x128xf32, #tpu.memory_space<vmem>>, vector<1x8x128xf32>
    %37 = vector.shape_cast %36 : vector<1x8x128xf32> to vector<8x128xf32>
    %38 = vector.broadcast %35 : f32 to vector<8x128xf32>
    %39 = arith.mulf %38, %37 : vector<8x128xf32>
    %40 = arith.addf %34, %39 : vector<8x128xf32>
    %c0_23 = arith.constant 0 : index
    %c5 = arith.constant 5 : index
    %41 = memref.load %arg1[%c0_23, %c5] : memref<3x8xf32, #tpu.memory_space<smem>>
    %c5_24 = arith.constant 5 : index
    %c0_25 = arith.constant 0 : index
    %c0_26 = arith.constant 0 : index
    %42 = vector.load %arg3[%c5_24, %c0_25, %c0_26] : memref<8x8x128xf32, #tpu.memory_space<vmem>>, vector<1x8x128xf32>
    %43 = vector.shape_cast %42 : vector<1x8x128xf32> to vector<8x128xf32>
    %44 = vector.broadcast %41 : f32 to vector<8x128xf32>
    %45 = arith.mulf %44, %43 : vector<8x128xf32>
    %46 = arith.addf %40, %45 : vector<8x128xf32>
    %c0_27 = arith.constant 0 : index
    %c6 = arith.constant 6 : index
    %47 = memref.load %arg1[%c0_27, %c6] : memref<3x8xf32, #tpu.memory_space<smem>>
    %c6_28 = arith.constant 6 : index
    %c0_29 = arith.constant 0 : index
    %c0_30 = arith.constant 0 : index
    %48 = vector.load %arg3[%c6_28, %c0_29, %c0_30] : memref<8x8x128xf32, #tpu.memory_space<vmem>>, vector<1x8x128xf32>
    %49 = vector.shape_cast %48 : vector<1x8x128xf32> to vector<8x128xf32>
    %50 = vector.broadcast %47 : f32 to vector<8x128xf32>
    %51 = arith.mulf %50, %49 : vector<8x128xf32>
    %52 = arith.addf %46, %51 : vector<8x128xf32>
    %c0_31 = arith.constant 0 : index
    %c7 = arith.constant 7 : index
    %53 = memref.load %arg1[%c0_31, %c7] : memref<3x8xf32, #tpu.memory_space<smem>>
    %c7_32 = arith.constant 7 : index
    %c0_33 = arith.constant 0 : index
    %c0_34 = arith.constant 0 : index
    %54 = vector.load %arg3[%c7_32, %c0_33, %c0_34] : memref<8x8x128xf32, #tpu.memory_space<vmem>>, vector<1x8x128xf32>
    %55 = vector.shape_cast %54 : vector<1x8x128xf32> to vector<8x128xf32>
    %56 = vector.broadcast %53 : f32 to vector<8x128xf32>
    %57 = arith.mulf %56, %55 : vector<8x128xf32>
    %58 = arith.addf %52, %57 : vector<8x128xf32>
    %59 = arith.subf %10, %58 : vector<8x128xf32>
    %cst_35 = arith.constant 2.000000e-02 : f32
    %60 = vector.broadcast %cst_35 : f32 to vector<8x128xf32>
    %61 = arith.mulf %60, %59 : vector<8x128xf32>
    %62 = math.exp %61 : vector<8x128xf32>
    %cst_36 = arith.constant 0.000000e+00 : f32
    %63 = vector.broadcast %cst_36 : f32 to vector<8x128xf32>
    %64 = arith.subf %63, %61 : vector<8x128xf32>
    %65 = math.exp %64 : vector<8x128xf32>
    %66 = arith.subf %62, %65 : vector<8x128xf32>
    %cst_37 = arith.constant 5.000000e-04 : f32
    %67 = vector.broadcast %cst_37 : f32 to vector<8x128xf32>
    %68 = arith.mulf %67, %66 : vector<8x128xf32>
    %69 = arith.addf %62, %65 : vector<8x128xf32>
    %cst_38 = arith.constant 9.99999974E-6 : f32
    %70 = vector.broadcast %cst_38 : f32 to vector<8x128xf32>
    %71 = arith.mulf %70, %69 : vector<8x128xf32>
    %cst_39 = arith.constant 0.000000e+00 : f32
    %72 = vector.broadcast %cst_39 : f32 to vector<8x128xf32>
    %73 = math.tanh %72 : vector<8x128xf32>
    %cst_40 = arith.constant 2.000000e-01 : f32
    %74 = vector.broadcast %cst_40 : f32 to vector<8x128xf32>
    %75 = arith.mulf %74, %73 : vector<8x128xf32>
    %cst_41 = arith.constant 1.000000e+00 : f32
    %76 = vector.broadcast %cst_41 : f32 to vector<8x128xf32>
    %77 = arith.addf %76, %75 : vector<8x128xf32>
    %78 = arith.mulf %68, %77 : vector<8x128xf32>
    %79 = arith.mulf %73, %73 : vector<8x128xf32>
    %cst_42 = arith.constant 1.000000e+00 : f32
    %80 = vector.broadcast %cst_42 : f32 to vector<8x128xf32>
    %81 = arith.subf %80, %79 : vector<8x128xf32>
    %cst_43 = arith.constant 2.000000e-01 : f32
    %82 = vector.broadcast %cst_43 : f32 to vector<8x128xf32>
    %83 = arith.mulf %82, %81 : vector<8x128xf32>
    %84 = arith.mulf %68, %83 : vector<8x128xf32>
    %85 = arith.subf %72, %78 : vector<8x128xf32>
    %86 = arith.mulf %17, %85 : vector<8x128xf32>
    %87 = arith.subf %86, %5 : vector<8x128xf32>
    %cst_44 = arith.constant 1.000000e+00 : f32
    %88 = vector.broadcast %cst_44 : f32 to vector<8x128xf32>
    %89 = arith.subf %88, %84 : vector<8x128xf32>
    %90 = arith.mulf %17, %89 : vector<8x128xf32>
    %91 = tpu.reciprocal %90 {approx = true} : vector<8x128xf32> -> vector<8x128xf32>
    %92 = arith.mulf %87, %91 : vector<8x128xf32>
    %93 = arith.subf %72, %92 : vector<8x128xf32>
    %94 = math.tanh %93 : vector<8x128xf32>
    %cst_45 = arith.constant 2.000000e-01 : f32
    %95 = vector.broadcast %cst_45 : f32 to vector<8x128xf32>
    %96 = arith.mulf %95, %94 : vector<8x128xf32>
    %cst_46 = arith.constant 1.000000e+00 : f32
    %97 = vector.broadcast %cst_46 : f32 to vector<8x128xf32>
    %98 = arith.addf %97, %96 : vector<8x128xf32>
    %99 = arith.mulf %68, %98 : vector<8x128xf32>
    %100 = arith.mulf %94, %94 : vector<8x128xf32>
    %cst_47 = arith.constant 1.000000e+00 : f32
    %101 = vector.broadcast %cst_47 : f32 to vector<8x128xf32>
    %102 = arith.subf %101, %100 : vector<8x128xf32>
    %cst_48 = arith.constant 2.000000e-01 : f32
    %103 = vector.broadcast %cst_48 : f32 to vector<8x128xf32>
    %104 = arith.mulf %103, %102 : vector<8x128xf32>
    %105 = arith.mulf %68, %104 : vector<8x128xf32>
    %106 = arith.subf %93, %99 : vector<8x128xf32>
    %107 = arith.mulf %17, %106 : vector<8x128xf32>
    %108 = arith.subf %107, %5 : vector<8x128xf32>
    %cst_49 = arith.constant 1.000000e+00 : f32
    %109 = vector.broadcast %cst_49 : f32 to vector<8x128xf32>
    %110 = arith.subf %109, %105 : vector<8x128xf32>
    %111 = arith.mulf %17, %110 : vector<8x128xf32>
    %112 = tpu.reciprocal %111 {approx = true} : vector<8x128xf32> -> vector<8x128xf32>
    %113 = arith.mulf %108, %112 : vector<8x128xf32>
    %114 = arith.subf %93, %113 : vector<8x128xf32>
    %115 = math.tanh %114 : vector<8x128xf32>
    %cst_50 = arith.constant 2.000000e-01 : f32
    %116 = vector.broadcast %cst_50 : f32 to vector<8x128xf32>
    %117 = arith.mulf %116, %115 : vector<8x128xf32>
    %cst_51 = arith.constant 1.000000e+00 : f32
    %118 = vector.broadcast %cst_51 : f32 to vector<8x128xf32>
    %119 = arith.addf %118, %117 : vector<8x128xf32>
    %120 = arith.mulf %68, %119 : vector<8x128xf32>
    %121 = arith.mulf %115, %115 : vector<8x128xf32>
    %cst_52 = arith.constant 1.000000e+00 : f32
    %122 = vector.broadcast %cst_52 : f32 to vector<8x128xf32>
    %123 = arith.subf %122, %121 : vector<8x128xf32>
    %cst_53 = arith.constant 2.000000e-01 : f32
    %124 = vector.broadcast %cst_53 : f32 to vector<8x128xf32>
    %125 = arith.mulf %124, %123 : vector<8x128xf32>
    %126 = arith.mulf %68, %125 : vector<8x128xf32>
    %127 = arith.subf %114, %120 : vector<8x128xf32>
    %128 = arith.mulf %17, %127 : vector<8x128xf32>
    %129 = arith.subf %128, %5 : vector<8x128xf32>
    %cst_54 = arith.constant 1.000000e+00 : f32
    %130 = vector.broadcast %cst_54 : f32 to vector<8x128xf32>
    %131 = arith.subf %130, %126 : vector<8x128xf32>
    %132 = arith.mulf %17, %131 : vector<8x128xf32>
    %133 = tpu.reciprocal %132 {approx = true} : vector<8x128xf32> -> vector<8x128xf32>
    %134 = arith.mulf %129, %133 : vector<8x128xf32>
    %135 = arith.subf %114, %134 : vector<8x128xf32>
    %136 = math.tanh %135 : vector<8x128xf32>
    %cst_55 = arith.constant 2.000000e-01 : f32
    %137 = vector.broadcast %cst_55 : f32 to vector<8x128xf32>
    %138 = arith.mulf %137, %136 : vector<8x128xf32>
    %cst_56 = arith.constant 1.000000e+00 : f32
    %139 = vector.broadcast %cst_56 : f32 to vector<8x128xf32>
    %140 = arith.addf %139, %138 : vector<8x128xf32>
    %141 = arith.mulf %68, %140 : vector<8x128xf32>
    %142 = arith.mulf %136, %136 : vector<8x128xf32>
    %cst_57 = arith.constant 1.000000e+00 : f32
    %143 = vector.broadcast %cst_57 : f32 to vector<8x128xf32>
    %144 = arith.subf %143, %142 : vector<8x128xf32>
    %cst_58 = arith.constant 2.000000e-01 : f32
    %145 = vector.broadcast %cst_58 : f32 to vector<8x128xf32>
    %146 = arith.mulf %145, %144 : vector<8x128xf32>
    %147 = arith.mulf %68, %146 : vector<8x128xf32>
    %148 = arith.subf %135, %141 : vector<8x128xf32>
    %149 = arith.mulf %17, %148 : vector<8x128xf32>
    %150 = arith.subf %149, %5 : vector<8x128xf32>
    %cst_59 = arith.constant 1.000000e+00 : f32
    %151 = vector.broadcast %cst_59 : f32 to vector<8x128xf32>
    %152 = arith.subf %151, %147 : vector<8x128xf32>
    %153 = arith.mulf %17, %152 : vector<8x128xf32>
    %154 = tpu.reciprocal %153 {approx = true} : vector<8x128xf32> -> vector<8x128xf32>
    %155 = arith.mulf %150, %154 : vector<8x128xf32>
    %156 = arith.subf %135, %155 : vector<8x128xf32>
    %157 = math.tanh %156 : vector<8x128xf32>
    %cst_60 = arith.constant 2.000000e-01 : f32
    %158 = vector.broadcast %cst_60 : f32 to vector<8x128xf32>
    %159 = arith.mulf %158, %157 : vector<8x128xf32>
    %cst_61 = arith.constant 1.000000e+00 : f32
    %160 = vector.broadcast %cst_61 : f32 to vector<8x128xf32>
    %161 = arith.addf %160, %159 : vector<8x128xf32>
    %162 = arith.mulf %68, %161 : vector<8x128xf32>
    %163 = arith.mulf %157, %157 : vector<8x128xf32>
    %cst_62 = arith.constant 1.000000e+00 : f32
    %164 = vector.broadcast %cst_62 : f32 to vector<8x128xf32>
    %165 = arith.subf %164, %163 : vector<8x128xf32>
    %cst_63 = arith.constant 2.000000e-01 : f32
    %166 = vector.broadcast %cst_63 : f32 to vector<8x128xf32>
    %167 = arith.mulf %166, %165 : vector<8x128xf32>
    %168 = arith.mulf %68, %167 : vector<8x128xf32>
    %169 = arith.subf %156, %162 : vector<8x128xf32>
    %170 = arith.mulf %17, %169 : vector<8x128xf32>
    %171 = arith.subf %170, %5 : vector<8x128xf32>
    %cst_64 = arith.constant 1.000000e+00 : f32
    %172 = vector.broadcast %cst_64 : f32 to vector<8x128xf32>
    %173 = arith.subf %172, %168 : vector<8x128xf32>
    %174 = arith.mulf %17, %173 : vector<8x128xf32>
    %175 = tpu.reciprocal %174 {approx = true} : vector<8x128xf32> -> vector<8x128xf32>
    %176 = arith.mulf %171, %175 : vector<8x128xf32>
    %177 = arith.subf %156, %176 : vector<8x128xf32>
    %178 = math.tanh %177 : vector<8x128xf32>
    %cst_65 = arith.constant 2.000000e-01 : f32
    %179 = vector.broadcast %cst_65 : f32 to vector<8x128xf32>
    %180 = arith.mulf %179, %178 : vector<8x128xf32>
    %cst_66 = arith.constant 1.000000e+00 : f32
    %181 = vector.broadcast %cst_66 : f32 to vector<8x128xf32>
    %182 = arith.addf %181, %180 : vector<8x128xf32>
    %183 = arith.mulf %68, %182 : vector<8x128xf32>
    %184 = arith.mulf %178, %178 : vector<8x128xf32>
    %cst_67 = arith.constant 1.000000e+00 : f32
    %185 = vector.broadcast %cst_67 : f32 to vector<8x128xf32>
    %186 = arith.subf %185, %184 : vector<8x128xf32>
    %cst_68 = arith.constant 2.000000e-01 : f32
    %187 = vector.broadcast %cst_68 : f32 to vector<8x128xf32>
    %188 = arith.mulf %187, %186 : vector<8x128xf32>
    %189 = arith.mulf %68, %188 : vector<8x128xf32>
    %190 = arith.subf %177, %183 : vector<8x128xf32>
    %191 = arith.mulf %17, %190 : vector<8x128xf32>
    %192 = arith.subf %191, %5 : vector<8x128xf32>
    %cst_69 = arith.constant 1.000000e+00 : f32
    %193 = vector.broadcast %cst_69 : f32 to vector<8x128xf32>
    %194 = arith.subf %193, %189 : vector<8x128xf32>
    %195 = arith.mulf %17, %194 : vector<8x128xf32>
    %196 = tpu.reciprocal %195 {approx = true} : vector<8x128xf32> -> vector<8x128xf32>
    %197 = arith.mulf %192, %196 : vector<8x128xf32>
    %198 = arith.subf %177, %197 : vector<8x128xf32>
    %199 = math.tanh %198 : vector<8x128xf32>
    %cst_70 = arith.constant 2.000000e-01 : f32
    %200 = vector.broadcast %cst_70 : f32 to vector<8x128xf32>
    %201 = arith.mulf %200, %199 : vector<8x128xf32>
    %cst_71 = arith.constant 1.000000e+00 : f32
    %202 = vector.broadcast %cst_71 : f32 to vector<8x128xf32>
    %203 = arith.addf %202, %201 : vector<8x128xf32>
    %204 = arith.mulf %68, %203 : vector<8x128xf32>
    %205 = arith.mulf %199, %199 : vector<8x128xf32>
    %cst_72 = arith.constant 1.000000e+00 : f32
    %206 = vector.broadcast %cst_72 : f32 to vector<8x128xf32>
    %207 = arith.subf %206, %205 : vector<8x128xf32>
    %cst_73 = arith.constant 2.000000e-01 : f32
    %208 = vector.broadcast %cst_73 : f32 to vector<8x128xf32>
    %209 = arith.mulf %208, %207 : vector<8x128xf32>
    %210 = arith.mulf %68, %209 : vector<8x128xf32>
    %211 = arith.mulf %71, %203 : vector<8x128xf32>
    %c0_74 = arith.constant 0 : index
    %c0_75 = arith.constant 0 : index
    %c0_76 = arith.constant 0 : index
    %212 = vector.load %arg4[%c0_74, %c0_75, %c0_76] : memref<8x8x128xf32, #tpu.memory_space<vmem>>, vector<1x8x128xf32>
    %213 = vector.shape_cast %212 : vector<1x8x128xf32> to vector<8x128xf32>
    %214 = vector.shape_cast %198 : vector<8x128xf32> to vector<1x8x128xf32>
    tpu.vector_store %arg4[%c0_74, %c0_75, %c0_76], %214 {strides = array<i32>} : memref<8x8x128xf32, #tpu.memory_space<vmem>>, vector<1x8x128xf32>,
    %c1_77 = arith.constant 1 : index
    %c1_78 = arith.constant 1 : index
    %215 = memref.load %arg1[%c1_77, %c1_78] : memref<3x8xf32, #tpu.memory_space<smem>>
    %216 = vector.broadcast %215 : f32 to vector<8x128xf32>
    %217 = arith.mulf %216, %204 : vector<8x128xf32>
    %c2_79 = arith.constant 2 : index
    %c1_80 = arith.constant 1 : index
    %218 = memref.load %arg1[%c2_79, %c1_80] : memref<3x8xf32, #tpu.memory_space<smem>>
    %c1_81 = arith.constant 1 : index
    %c0_82 = arith.constant 0 : index
    %c0_83 = arith.constant 0 : index
    %219 = vector.load %arg3[%c1_81, %c0_82, %c0_83] : memref<8x8x128xf32, #tpu.memory_space<vmem>>, vector<1x8x128xf32>
    %220 = vector.shape_cast %219 : vector<1x8x128xf32> to vector<8x128xf32>
    %221 = vector.broadcast %218 : f32 to vector<8x128xf32>
    %222 = arith.mulf %221, %220 : vector<8x128xf32>
    %223 = arith.subf %217, %222 : vector<8x128xf32>
    %c1_84 = arith.constant 1 : index
    %c0_85 = arith.constant 0 : index
    %c0_86 = arith.constant 0 : index
    %224 = vector.load %arg4[%c1_84, %c0_85, %c0_86] : memref<8x8x128xf32, #tpu.memory_space<vmem>>, vector<1x8x128xf32>
    %225 = vector.shape_cast %224 : vector<1x8x128xf32> to vector<8x128xf32>
    %226 = vector.shape_cast %223 : vector<8x128xf32> to vector<1x8x128xf32>
    tpu.vector_store %arg4[%c1_84, %c0_85, %c0_86], %226 {strides = array<i32>} : memref<8x8x128xf32, #tpu.memory_space<vmem>>, vector<1x8x128xf32>,
    %c1_87 = arith.constant 1 : index
    %c2_88 = arith.constant 2 : index
    %227 = memref.load %arg1[%c1_87, %c2_88] : memref<3x8xf32, #tpu.memory_space<smem>>
    %228 = vector.broadcast %227 : f32 to vector<8x128xf32>
    %229 = arith.mulf %228, %204 : vector<8x128xf32>
    %c2_89 = arith.constant 2 : index
    %c2_90 = arith.constant 2 : index
    %230 = memref.load %arg1[%c2_89, %c2_90] : memref<3x8xf32, #tpu.memory_space<smem>>
    %c2_91 = arith.constant 2 : index
    %c0_92 = arith.constant 0 : index
    %c0_93 = arith.constant 0 : index
    %231 = vector.load %arg3[%c2_91, %c0_92, %c0_93] : memref<8x8x128xf32, #tpu.memory_space<vmem>>, vector<1x8x128xf32>
    %232 = vector.shape_cast %231 : vector<1x8x128xf32> to vector<8x128xf32>
    %233 = vector.broadcast %230 : f32 to vector<8x128xf32>
    %234 = arith.mulf %233, %232 : vector<8x128xf32>
    %235 = arith.subf %229, %234 : vector<8x128xf32>
    %c2_94 = arith.constant 2 : index
    %c0_95 = arith.constant 0 : index
    %c0_96 = arith.constant 0 : index
    %236 = vector.load %arg4[%c2_94, %c0_95, %c0_96] : memref<8x8x128xf32, #tpu.memory_space<vmem>>, vector<1x8x128xf32>
    %237 = vector.shape_cast %236 : vector<1x8x128xf32> to vector<8x128xf32>
    %238 = vector.shape_cast %235 : vector<8x128xf32> to vector<1x8x128xf32>
    tpu.vector_store %arg4[%c2_94, %c0_95, %c0_96], %238 {strides = array<i32>} : memref<8x8x128xf32, #tpu.memory_space<vmem>>, vector<1x8x128xf32>,
    %c1_97 = arith.constant 1 : index
    %c3_98 = arith.constant 3 : index
    %239 = memref.load %arg1[%c1_97, %c3_98] : memref<3x8xf32, #tpu.memory_space<smem>>
    %240 = vector.broadcast %239 : f32 to vector<8x128xf32>
    %241 = arith.mulf %240, %204 : vector<8x128xf32>
    %c2_99 = arith.constant 2 : index
    %c3_100 = arith.constant 3 : index
    %242 = memref.load %arg1[%c2_99, %c3_100] : memref<3x8xf32, #tpu.memory_space<smem>>
    %c3_101 = arith.constant 3 : index
    %c0_102 = arith.constant 0 : index
    %c0_103 = arith.constant 0 : index
    %243 = vector.load %arg3[%c3_101, %c0_102, %c0_103] : memref<8x8x128xf32, #tpu.memory_space<vmem>>, vector<1x8x128xf32>
    %244 = vector.shape_cast %243 : vector<1x8x128xf32> to vector<8x128xf32>
    %245 = vector.broadcast %242 : f32 to vector<8x128xf32>
    %246 = arith.mulf %245, %244 : vector<8x128xf32>
    %247 = arith.subf %241, %246 : vector<8x128xf32>
    %c3_104 = arith.constant 3 : index
    %c0_105 = arith.constant 0 : index
    %c0_106 = arith.constant 0 : index
    %248 = vector.load %arg4[%c3_104, %c0_105, %c0_106] : memref<8x8x128xf32, #tpu.memory_space<vmem>>, vector<1x8x128xf32>
    %249 = vector.shape_cast %248 : vector<1x8x128xf32> to vector<8x128xf32>
    %250 = vector.shape_cast %247 : vector<8x128xf32> to vector<1x8x128xf32>
    tpu.vector_store %arg4[%c3_104, %c0_105, %c0_106], %250 {strides = array<i32>} : memref<8x8x128xf32, #tpu.memory_space<vmem>>, vector<1x8x128xf32>,
    %c1_107 = arith.constant 1 : index
    %c4_108 = arith.constant 4 : index
    %251 = memref.load %arg1[%c1_107, %c4_108] : memref<3x8xf32, #tpu.memory_space<smem>>
    %252 = vector.broadcast %251 : f32 to vector<8x128xf32>
    %253 = arith.mulf %252, %204 : vector<8x128xf32>
    %c2_109 = arith.constant 2 : index
    %c4_110 = arith.constant 4 : index
    %254 = memref.load %arg1[%c2_109, %c4_110] : memref<3x8xf32, #tpu.memory_space<smem>>
    %c4_111 = arith.constant 4 : index
    %c0_112 = arith.constant 0 : index
    %c0_113 = arith.constant 0 : index
    %255 = vector.load %arg3[%c4_111, %c0_112, %c0_113] : memref<8x8x128xf32, #tpu.memory_space<vmem>>, vector<1x8x128xf32>
    %256 = vector.shape_cast %255 : vector<1x8x128xf32> to vector<8x128xf32>
    %257 = vector.broadcast %254 : f32 to vector<8x128xf32>
    %258 = arith.mulf %257, %256 : vector<8x128xf32>
    %259 = arith.subf %253, %258 : vector<8x128xf32>
    %c4_114 = arith.constant 4 : index
    %c0_115 = arith.constant 0 : index
    %c0_116 = arith.constant 0 : index
    %260 = vector.load %arg4[%c4_114, %c0_115, %c0_116] : memref<8x8x128xf32, #tpu.memory_space<vmem>>, vector<1x8x128xf32>
    %261 = vector.shape_cast %260 : vector<1x8x128xf32> to vector<8x128xf32>
    %262 = vector.shape_cast %259 : vector<8x128xf32> to vector<1x8x128xf32>
    tpu.vector_store %arg4[%c4_114, %c0_115, %c0_116], %262 {strides = array<i32>} : memref<8x8x128xf32, #tpu.memory_space<vmem>>, vector<1x8x128xf32>,
    %c1_117 = arith.constant 1 : index
    %c5_118 = arith.constant 5 : index
    %263 = memref.load %arg1[%c1_117, %c5_118] : memref<3x8xf32, #tpu.memory_space<smem>>
    %264 = vector.broadcast %263 : f32 to vector<8x128xf32>
    %265 = arith.mulf %264, %204 : vector<8x128xf32>
    %c2_119 = arith.constant 2 : index
    %c5_120 = arith.constant 5 : index
    %266 = memref.load %arg1[%c2_119, %c5_120] : memref<3x8xf32, #tpu.memory_space<smem>>
    %c5_121 = arith.constant 5 : index
    %c0_122 = arith.constant 0 : index
    %c0_123 = arith.constant 0 : index
    %267 = vector.load %arg3[%c5_121, %c0_122, %c0_123] : memref<8x8x128xf32, #tpu.memory_space<vmem>>, vector<1x8x128xf32>
    %268 = vector.shape_cast %267 : vector<1x8x128xf32> to vector<8x128xf32>
    %269 = vector.broadcast %266 : f32 to vector<8x128xf32>
    %270 = arith.mulf %269, %268 : vector<8x128xf32>
    %271 = arith.subf %265, %270 : vector<8x128xf32>
    %c5_124 = arith.constant 5 : index
    %c0_125 = arith.constant 0 : index
    %c0_126 = arith.constant 0 : index
    %272 = vector.load %arg4[%c5_124, %c0_125, %c0_126] : memref<8x8x128xf32, #tpu.memory_space<vmem>>, vector<1x8x128xf32>
    %273 = vector.shape_cast %272 : vector<1x8x128xf32> to vector<8x128xf32>
    %274 = vector.shape_cast %271 : vector<8x128xf32> to vector<1x8x128xf32>
    tpu.vector_store %arg4[%c5_124, %c0_125, %c0_126], %274 {strides = array<i32>} : memref<8x8x128xf32, #tpu.memory_space<vmem>>, vector<1x8x128xf32>,
    %c1_127 = arith.constant 1 : index
    %c6_128 = arith.constant 6 : index
    %275 = memref.load %arg1[%c1_127, %c6_128] : memref<3x8xf32, #tpu.memory_space<smem>>
    %276 = vector.broadcast %275 : f32 to vector<8x128xf32>
    %277 = arith.mulf %276, %204 : vector<8x128xf32>
    %c2_129 = arith.constant 2 : index
    %c6_130 = arith.constant 6 : index
    %278 = memref.load %arg1[%c2_129, %c6_130] : memref<3x8xf32, #tpu.memory_space<smem>>
    %c6_131 = arith.constant 6 : index
    %c0_132 = arith.constant 0 : index
    %c0_133 = arith.constant 0 : index
    %279 = vector.load %arg3[%c6_131, %c0_132, %c0_133] : memref<8x8x128xf32, #tpu.memory_space<vmem>>, vector<1x8x128xf32>
    %280 = vector.shape_cast %279 : vector<1x8x128xf32> to vector<8x128xf32>
    %281 = vector.broadcast %278 : f32 to vector<8x128xf32>
    %282 = arith.mulf %281, %280 : vector<8x128xf32>
    %283 = arith.subf %277, %282 : vector<8x128xf32>
    %c6_134 = arith.constant 6 : index
    %c0_135 = arith.constant 0 : index
    %c0_136 = arith.constant 0 : index
    %284 = vector.load %arg4[%c6_134, %c0_135, %c0_136] : memref<8x8x128xf32, #tpu.memory_space<vmem>>, vector<1x8x128xf32>
    %285 = vector.shape_cast %284 : vector<1x8x128xf32> to vector<8x128xf32>
    %286 = vector.shape_cast %283 : vector<8x128xf32> to vector<1x8x128xf32>
    tpu.vector_store %arg4[%c6_134, %c0_135, %c0_136], %286 {strides = array<i32>} : memref<8x8x128xf32, #tpu.memory_space<vmem>>, vector<1x8x128xf32>,
    %c1_137 = arith.constant 1 : index
    %c7_138 = arith.constant 7 : index
    %287 = memref.load %arg1[%c1_137, %c7_138] : memref<3x8xf32, #tpu.memory_space<smem>>
    %288 = vector.broadcast %287 : f32 to vector<8x128xf32>
    %289 = arith.mulf %288, %204 : vector<8x128xf32>
    %c2_139 = arith.constant 2 : index
    %c7_140 = arith.constant 7 : index
    %290 = memref.load %arg1[%c2_139, %c7_140] : memref<3x8xf32, #tpu.memory_space<smem>>
    %c7_141 = arith.constant 7 : index
    %c0_142 = arith.constant 0 : index
    %c0_143 = arith.constant 0 : index
    %291 = vector.load %arg3[%c7_141, %c0_142, %c0_143] : memref<8x8x128xf32, #tpu.memory_space<vmem>>, vector<1x8x128xf32>
    %292 = vector.shape_cast %291 : vector<1x8x128xf32> to vector<8x128xf32>
    %293 = vector.broadcast %290 : f32 to vector<8x128xf32>
    %294 = arith.mulf %293, %292 : vector<8x128xf32>
    %295 = arith.subf %289, %294 : vector<8x128xf32>
    %c7_144 = arith.constant 7 : index
    %c0_145 = arith.constant 0 : index
    %c0_146 = arith.constant 0 : index
    %296 = vector.load %arg4[%c7_144, %c0_145, %c0_146] : memref<8x8x128xf32, #tpu.memory_space<vmem>>, vector<1x8x128xf32>
    %297 = vector.shape_cast %296 : vector<1x8x128xf32> to vector<8x128xf32>
    %298 = vector.shape_cast %295 : vector<8x128xf32> to vector<1x8x128xf32>
    tpu.vector_store %arg4[%c7_144, %c0_145, %c0_146], %298 {strides = array<i32>} : memref<8x8x128xf32, #tpu.memory_space<vmem>>, vector<1x8x128xf32>,
    %cst_147 = arith.constant 1.000000e+00 : f32
    %299 = vector.broadcast %cst_147 : f32 to vector<8x128xf32>
    %300 = arith.subf %299, %210 : vector<8x128xf32>
    %301 = arith.mulf %17, %300 : vector<8x128xf32>
    %302 = tpu.reciprocal %301 {approx = true} : vector<8x128xf32> -> vector<8x128xf32>
    %303 = arith.mulf %301, %302 : vector<8x128xf32>
    %cst_148 = arith.constant 2.000000e+00 : f32
    %304 = vector.broadcast %cst_148 : f32 to vector<8x128xf32>
    %305 = arith.subf %304, %303 : vector<8x128xf32>
    %306 = arith.mulf %302, %305 : vector<8x128xf32>
    %307 = arith.mulf %17, %211 : vector<8x128xf32>
    %cst_149 = arith.constant 0.000000e+00 : f32
    %308 = vector.broadcast %cst_149 : f32 to vector<8x128xf32>
    %309 = arith.subf %308, %307 : vector<8x128xf32>
    %310 = arith.mulf %309, %306 : vector<8x128xf32>
    %cst_150 = arith.constant 0.000000e+00 : f32
    %311 = vector.broadcast %cst_150 : f32 to vector<8x128xf32>
    %312 = arith.subf %311, %211 : vector<8x128xf32>
    %c0_151 = arith.constant 0 : index
    %c0_152 = arith.constant 0 : index
    %313 = memref.load %arg1[%c0_151, %c0_152] : memref<3x8xf32, #tpu.memory_space<smem>>
    %314 = vector.broadcast %313 : f32 to vector<8x128xf32>
    %315 = arith.mulf %314, %310 : vector<8x128xf32>
    %c0_153 = arith.constant 0 : index
    %c0_154 = arith.constant 0 : index
    %c0_155 = arith.constant 0 : index
    %316 = vector.load %arg5[%c0_153, %c0_154, %c0_155] : memref<64x8x128xf32, #tpu.memory_space<vmem>>, vector<1x8x128xf32>
    %317 = vector.shape_cast %316 : vector<1x8x128xf32> to vector<8x128xf32>
    %318 = vector.shape_cast %315 : vector<8x128xf32> to vector<1x8x128xf32>
    tpu.vector_store %arg5[%c0_153, %c0_154, %c0_155], %318 {strides = array<i32>} : memref<64x8x128xf32, #tpu.memory_space<vmem>>, vector<1x8x128xf32>,
    %c0_156 = arith.constant 0 : index
    %c1_157 = arith.constant 1 : index
    %319 = memref.load %arg1[%c0_156, %c1_157] : memref<3x8xf32, #tpu.memory_space<smem>>
    %320 = vector.broadcast %319 : f32 to vector<8x128xf32>
    %321 = arith.mulf %320, %310 : vector<8x128xf32>
    %c1_158 = arith.constant 1 : index
    %c0_159 = arith.constant 0 : index
    %c0_160 = arith.constant 0 : index
    %322 = vector.load %arg5[%c1_158, %c0_159, %c0_160] : memref<64x8x128xf32, #tpu.memory_space<vmem>>, vector<1x8x128xf32>
    %323 = vector.shape_cast %322 : vector<1x8x128xf32> to vector<8x128xf32>
    %324 = vector.shape_cast %321 : vector<8x128xf32> to vector<1x8x128xf32>
    tpu.vector_store %arg5[%c1_158, %c0_159, %c0_160], %324 {strides = array<i32>} : memref<64x8x128xf32, #tpu.memory_space<vmem>>, vector<1x8x128xf32>,
    %c0_161 = arith.constant 0 : index
    %c2_162 = arith.constant 2 : index
    %325 = memref.load %arg1[%c0_161, %c2_162] : memref<3x8xf32, #tpu.memory_space<smem>>
    %326 = vector.broadcast %325 : f32 to vector<8x128xf32>
    %327 = arith.mulf %326, %310 : vector<8x128xf32>
    %c2_163 = arith.constant 2 : index
    %c0_164 = arith.constant 0 : index
    %c0_165 = arith.constant 0 : index
    %328 = vector.load %arg5[%c2_163, %c0_164, %c0_165] : memref<64x8x128xf32, #tpu.memory_space<vmem>>, vector<1x8x128xf32>
    %329 = vector.shape_cast %328 : vector<1x8x128xf32> to vector<8x128xf32>
    %330 = vector.shape_cast %327 : vector<8x128xf32> to vector<1x8x128xf32>
    tpu.vector_store %arg5[%c2_163, %c0_164, %c0_165], %330 {strides = array<i32>} : memref<64x8x128xf32, #tpu.memory_space<vmem>>, vector<1x8x128xf32>,
    %c0_166 = arith.constant 0 : index
    %c3_167 = arith.constant 3 : index
    %331 = memref.load %arg1[%c0_166, %c3_167] : memref<3x8xf32, #tpu.memory_space<smem>>
    %332 = vector.broadcast %331 : f32 to vector<8x128xf32>
    %333 = arith.mulf %332, %310 : vector<8x128xf32>
    %c3_168 = arith.constant 3 : index
    %c0_169 = arith.constant 0 : index
    %c0_170 = arith.constant 0 : index
    %334 = vector.load %arg5[%c3_168, %c0_169, %c0_170] : memref<64x8x128xf32, #tpu.memory_space<vmem>>, vector<1x8x128xf32>
    %335 = vector.shape_cast %334 : vector<1x8x128xf32> to vector<8x128xf32>
    %336 = vector.shape_cast %333 : vector<8x128xf32> to vector<1x8x128xf32>
    tpu.vector_store %arg5[%c3_168, %c0_169, %c0_170], %336 {strides = array<i32>} : memref<64x8x128xf32, #tpu.memory_space<vmem>>, vector<1x8x128xf32>,
    %c0_171 = arith.constant 0 : index
    %c4_172 = arith.constant 4 : index
    %337 = memref.load %arg1[%c0_171, %c4_172] : memref<3x8xf32, #tpu.memory_space<smem>>
    %338 = vector.broadcast %337 : f32 to vector<8x128xf32>
    %339 = arith.mulf %338, %310 : vector<8x128xf32>
    %c4_173 = arith.constant 4 : index
    %c0_174 = arith.constant 0 : index
    %c0_175 = arith.constant 0 : index
    %340 = vector.load %arg5[%c4_173, %c0_174, %c0_175] : memref<64x8x128xf32, #tpu.memory_space<vmem>>, vector<1x8x128xf32>
    %341 = vector.shape_cast %340 : vector<1x8x128xf32> to vector<8x128xf32>
    %342 = vector.shape_cast %339 : vector<8x128xf32> to vector<1x8x128xf32>
    tpu.vector_store %arg5[%c4_173, %c0_174, %c0_175], %342 {strides = array<i32>} : memref<64x8x128xf32, #tpu.memory_space<vmem>>, vector<1x8x128xf32>,
    %c0_176 = arith.constant 0 : index
    %c5_177 = arith.constant 5 : index
    %343 = memref.load %arg1[%c0_176, %c5_177] : memref<3x8xf32, #tpu.memory_space<smem>>
    %344 = vector.broadcast %343 : f32 to vector<8x128xf32>
    %345 = arith.mulf %344, %310 : vector<8x128xf32>
    %c5_178 = arith.constant 5 : index
    %c0_179 = arith.constant 0 : index
    %c0_180 = arith.constant 0 : index
    %346 = vector.load %arg5[%c5_178, %c0_179, %c0_180] : memref<64x8x128xf32, #tpu.memory_space<vmem>>, vector<1x8x128xf32>
    %347 = vector.shape_cast %346 : vector<1x8x128xf32> to vector<8x128xf32>
    %348 = vector.shape_cast %345 : vector<8x128xf32> to vector<1x8x128xf32>
    tpu.vector_store %arg5[%c5_178, %c0_179, %c0_180], %348 {strides = array<i32>} : memref<64x8x128xf32, #tpu.memory_space<vmem>>, vector<1x8x128xf32>,
    %c0_181 = arith.constant 0 : index
    %c6_182 = arith.constant 6 : index
    %349 = memref.load %arg1[%c0_181, %c6_182] : memref<3x8xf32, #tpu.memory_space<smem>>
    %350 = vector.broadcast %349 : f32 to vector<8x128xf32>
    %351 = arith.mulf %350, %310 : vector<8x128xf32>
    %c6_183 = arith.constant 6 : index
    %c0_184 = arith.constant 0 : index
    %c0_185 = arith.constant 0 : index
    %352 = vector.load %arg5[%c6_183, %c0_184, %c0_185] : memref<64x8x128xf32, #tpu.memory_space<vmem>>, vector<1x8x128xf32>
    %353 = vector.shape_cast %352 : vector<1x8x128xf32> to vector<8x128xf32>
    %354 = vector.shape_cast %351 : vector<8x128xf32> to vector<1x8x128xf32>
    tpu.vector_store %arg5[%c6_183, %c0_184, %c0_185], %354 {strides = array<i32>} : memref<64x8x128xf32, #tpu.memory_space<vmem>>, vector<1x8x128xf32>,
    %c0_186 = arith.constant 0 : index
    %c7_187 = arith.constant 7 : index
    %355 = memref.load %arg1[%c0_186, %c7_187] : memref<3x8xf32, #tpu.memory_space<smem>>
    %356 = vector.broadcast %355 : f32 to vector<8x128xf32>
    %357 = arith.mulf %356, %310 : vector<8x128xf32>
    %c7_188 = arith.constant 7 : index
    %c0_189 = arith.constant 0 : index
    %c0_190 = arith.constant 0 : index
    %358 = vector.load %arg5[%c7_188, %c0_189, %c0_190] : memref<64x8x128xf32, #tpu.memory_space<vmem>>, vector<1x8x128xf32>
    %359 = vector.shape_cast %358 : vector<1x8x128xf32> to vector<8x128xf32>
    %360 = vector.shape_cast %357 : vector<8x128xf32> to vector<1x8x128xf32>
    tpu.vector_store %arg5[%c7_188, %c0_189, %c0_190], %360 {strides = array<i32>} : memref<64x8x128xf32, #tpu.memory_space<vmem>>, vector<1x8x128xf32>,
    %c1_191 = arith.constant 1 : index
    %c1_192 = arith.constant 1 : index
    %361 = memref.load %arg1[%c1_191, %c1_192] : memref<3x8xf32, #tpu.memory_space<smem>>
    %362 = vector.broadcast %361 : f32 to vector<8x128xf32>
    %363 = arith.mulf %362, %312 : vector<8x128xf32>
    %c0_193 = arith.constant 0 : index
    %c0_194 = arith.constant 0 : index
    %364 = memref.load %arg1[%c0_193, %c0_194] : memref<3x8xf32, #tpu.memory_space<smem>>
    %365 = vector.broadcast %364 : f32 to vector<8x128xf32>
    %366 = arith.mulf %365, %363 : vector<8x128xf32>
    %c8 = arith.constant 8 : index
    %c0_195 = arith.constant 0 : index
    %c0_196 = arith.constant 0 : index
    %367 = vector.load %arg5[%c8, %c0_195, %c0_196] : memref<64x8x128xf32, #tpu.memory_space<vmem>>, vector<1x8x128xf32>
    %368 = vector.shape_cast %367 : vector<1x8x128xf32> to vector<8x128xf32>
    %369 = vector.shape_cast %366 : vector<8x128xf32> to vector<1x8x128xf32>
    tpu.vector_store %arg5[%c8, %c0_195, %c0_196], %369 {strides = array<i32>} : memref<64x8x128xf32, #tpu.memory_space<vmem>>, vector<1x8x128xf32>,
    %c0_197 = arith.constant 0 : index
    %c1_198 = arith.constant 1 : index
    %370 = memref.load %arg1[%c0_197, %c1_198] : memref<3x8xf32, #tpu.memory_space<smem>>
    %371 = vector.broadcast %370 : f32 to vector<8x128xf32>
    %372 = arith.mulf %371, %363 : vector<8x128xf32>
    %c2_199 = arith.constant 2 : index
    %c1_200 = arith.constant 1 : index
    %373 = memref.load %arg1[%c2_199, %c1_200] : memref<3x8xf32, #tpu.memory_space<smem>>
    %374 = vector.broadcast %373 : f32 to vector<8x128xf32>
    %375 = arith.subf %372, %374 : vector<8x128xf32>
    %c9 = arith.constant 9 : index
    %c0_201 = arith.constant 0 : index
    %c0_202 = arith.constant 0 : index
    %376 = vector.load %arg5[%c9, %c0_201, %c0_202] : memref<64x8x128xf32, #tpu.memory_space<vmem>>, vector<1x8x128xf32>
    %377 = vector.shape_cast %376 : vector<1x8x128xf32> to vector<8x128xf32>
    %378 = vector.shape_cast %375 : vector<8x128xf32> to vector<1x8x128xf32>
    tpu.vector_store %arg5[%c9, %c0_201, %c0_202], %378 {strides = array<i32>} : memref<64x8x128xf32, #tpu.memory_space<vmem>>, vector<1x8x128xf32>,
    %c0_203 = arith.constant 0 : index
    %c2_204 = arith.constant 2 : index
    %379 = memref.load %arg1[%c0_203, %c2_204] : memref<3x8xf32, #tpu.memory_space<smem>>
    %380 = vector.broadcast %379 : f32 to vector<8x128xf32>
    %381 = arith.mulf %380, %363 : vector<8x128xf32>
    %c10 = arith.constant 10 : index
    %c0_205 = arith.constant 0 : index
    %c0_206 = arith.constant 0 : index
    %382 = vector.load %arg5[%c10, %c0_205, %c0_206] : memref<64x8x128xf32, #tpu.memory_space<vmem>>, vector<1x8x128xf32>
    %383 = vector.shape_cast %382 : vector<1x8x128xf32> to vector<8x128xf32>
    %384 = vector.shape_cast %381 : vector<8x128xf32> to vector<1x8x128xf32>
    tpu.vector_store %arg5[%c10, %c0_205, %c0_206], %384 {strides = array<i32>} : memref<64x8x128xf32, #tpu.memory_space<vmem>>, vector<1x8x128xf32>,
    %c0_207 = arith.constant 0 : index
    %c3_208 = arith.constant 3 : index
    %385 = memref.load %arg1[%c0_207, %c3_208] : memref<3x8xf32, #tpu.memory_space<smem>>
    %386 = vector.broadcast %385 : f32 to vector<8x128xf32>
    %387 = arith.mulf %386, %363 : vector<8x128xf32>
    %c11 = arith.constant 11 : index
    %c0_209 = arith.constant 0 : index
    %c0_210 = arith.constant 0 : index
    %388 = vector.load %arg5[%c11, %c0_209, %c0_210] : memref<64x8x128xf32, #tpu.memory_space<vmem>>, vector<1x8x128xf32>
    %389 = vector.shape_cast %388 : vector<1x8x128xf32> to vector<8x128xf32>
    %390 = vector.shape_cast %387 : vector<8x128xf32> to vector<1x8x128xf32>
    tpu.vector_store %arg5[%c11, %c0_209, %c0_210], %390 {strides = array<i32>} : memref<64x8x128xf32, #tpu.memory_space<vmem>>, vector<1x8x128xf32>,
    %c0_211 = arith.constant 0 : index
    %c4_212 = arith.constant 4 : index
    %391 = memref.load %arg1[%c0_211, %c4_212] : memref<3x8xf32, #tpu.memory_space<smem>>
    %392 = vector.broadcast %391 : f32 to vector<8x128xf32>
    %393 = arith.mulf %392, %363 : vector<8x128xf32>
    %c12 = arith.constant 12 : index
    %c0_213 = arith.constant 0 : index
    %c0_214 = arith.constant 0 : index
    %394 = vector.load %arg5[%c12, %c0_213, %c0_214] : memref<64x8x128xf32, #tpu.memory_space<vmem>>, vector<1x8x128xf32>
    %395 = vector.shape_cast %394 : vector<1x8x128xf32> to vector<8x128xf32>
    %396 = vector.shape_cast %393 : vector<8x128xf32> to vector<1x8x128xf32>
    tpu.vector_store %arg5[%c12, %c0_213, %c0_214], %396 {strides = array<i32>} : memref<64x8x128xf32, #tpu.memory_space<vmem>>, vector<1x8x128xf32>,
    %c0_215 = arith.constant 0 : index
    %c5_216 = arith.constant 5 : index
    %397 = memref.load %arg1[%c0_215, %c5_216] : memref<3x8xf32, #tpu.memory_space<smem>>
    %398 = vector.broadcast %397 : f32 to vector<8x128xf32>
    %399 = arith.mulf %398, %363 : vector<8x128xf32>
    %c13 = arith.constant 13 : index
    %c0_217 = arith.constant 0 : index
    %c0_218 = arith.constant 0 : index
    %400 = vector.load %arg5[%c13, %c0_217, %c0_218] : memref<64x8x128xf32, #tpu.memory_space<vmem>>, vector<1x8x128xf32>
    %401 = vector.shape_cast %400 : vector<1x8x128xf32> to vector<8x128xf32>
    %402 = vector.shape_cast %399 : vector<8x128xf32> to vector<1x8x128xf32>
    tpu.vector_store %arg5[%c13, %c0_217, %c0_218], %402 {strides = array<i32>} : memref<64x8x128xf32, #tpu.memory_space<vmem>>, vector<1x8x128xf32>,
    %c0_219 = arith.constant 0 : index
    %c6_220 = arith.constant 6 : index
    %403 = memref.load %arg1[%c0_219, %c6_220] : memref<3x8xf32, #tpu.memory_space<smem>>
    %404 = vector.broadcast %403 : f32 to vector<8x128xf32>
    %405 = arith.mulf %404, %363 : vector<8x128xf32>
    %c14 = arith.constant 14 : index
    %c0_221 = arith.constant 0 : index
    %c0_222 = arith.constant 0 : index
    %406 = vector.load %arg5[%c14, %c0_221, %c0_222] : memref<64x8x128xf32, #tpu.memory_space<vmem>>, vector<1x8x128xf32>
    %407 = vector.shape_cast %406 : vector<1x8x128xf32> to vector<8x128xf32>
    %408 = vector.shape_cast %405 : vector<8x128xf32> to vector<1x8x128xf32>
    tpu.vector_store %arg5[%c14, %c0_221, %c0_222], %408 {strides = array<i32>} : memref<64x8x128xf32, #tpu.memory_space<vmem>>, vector<1x8x128xf32>,
    %c0_223 = arith.constant 0 : index
    %c7_224 = arith.constant 7 : index
    %409 = memref.load %arg1[%c0_223, %c7_224] : memref<3x8xf32, #tpu.memory_space<smem>>
    %410 = vector.broadcast %409 : f32 to vector<8x128xf32>
    %411 = arith.mulf %410, %363 : vector<8x128xf32>
    %c15 = arith.constant 15 : index
    %c0_225 = arith.constant 0 : index
    %c0_226 = arith.constant 0 : index
    %412 = vector.load %arg5[%c15, %c0_225, %c0_226] : memref<64x8x128xf32, #tpu.memory_space<vmem>>, vector<1x8x128xf32>
    %413 = vector.shape_cast %412 : vector<1x8x128xf32> to vector<8x128xf32>
    %414 = vector.shape_cast %411 : vector<8x128xf32> to vector<1x8x128xf32>
    tpu.vector_store %arg5[%c15, %c0_225, %c0_226], %414 {strides = array<i32>} : memref<64x8x128xf32, #tpu.memory_space<vmem>>, vector<1x8x128xf32>,
    %c1_227 = arith.constant 1 : index
    %c2_228 = arith.constant 2 : index
    %415 = memref.load %arg1[%c1_227, %c2_228] : memref<3x8xf32, #tpu.memory_space<smem>>
    %416 = vector.broadcast %415 : f32 to vector<8x128xf32>
    %417 = arith.mulf %416, %312 : vector<8x128xf32>
    %c0_229 = arith.constant 0 : index
    %c0_230 = arith.constant 0 : index
    %418 = memref.load %arg1[%c0_229, %c0_230] : memref<3x8xf32, #tpu.memory_space<smem>>
    %419 = vector.broadcast %418 : f32 to vector<8x128xf32>
    %420 = arith.mulf %419, %417 : vector<8x128xf32>
    %c16 = arith.constant 16 : index
    %c0_231 = arith.constant 0 : index
    %c0_232 = arith.constant 0 : index
    %421 = vector.load %arg5[%c16, %c0_231, %c0_232] : memref<64x8x128xf32, #tpu.memory_space<vmem>>, vector<1x8x128xf32>
    %422 = vector.shape_cast %421 : vector<1x8x128xf32> to vector<8x128xf32>
    %423 = vector.shape_cast %420 : vector<8x128xf32> to vector<1x8x128xf32>
    tpu.vector_store %arg5[%c16, %c0_231, %c0_232], %423 {strides = array<i32>} : memref<64x8x128xf32, #tpu.memory_space<vmem>>, vector<1x8x128xf32>,
    %c0_233 = arith.constant 0 : index
    %c1_234 = arith.constant 1 : index
    %424 = memref.load %arg1[%c0_233, %c1_234] : memref<3x8xf32, #tpu.memory_space<smem>>
    %425 = vector.broadcast %424 : f32 to vector<8x128xf32>
    %426 = arith.mulf %425, %417 : vector<8x128xf32>
    %c17 = arith.constant 17 : index
    %c0_235 = arith.constant 0 : index
    %c0_236 = arith.constant 0 : index
    %427 = vector.load %arg5[%c17, %c0_235, %c0_236] : memref<64x8x128xf32, #tpu.memory_space<vmem>>, vector<1x8x128xf32>
    %428 = vector.shape_cast %427 : vector<1x8x128xf32> to vector<8x128xf32>
    %429 = vector.shape_cast %426 : vector<8x128xf32> to vector<1x8x128xf32>
    tpu.vector_store %arg5[%c17, %c0_235, %c0_236], %429 {strides = array<i32>} : memref<64x8x128xf32, #tpu.memory_space<vmem>>, vector<1x8x128xf32>,
    %c0_237 = arith.constant 0 : index
    %c2_238 = arith.constant 2 : index
    %430 = memref.load %arg1[%c0_237, %c2_238] : memref<3x8xf32, #tpu.memory_space<smem>>
    %431 = vector.broadcast %430 : f32 to vector<8x128xf32>
    %432 = arith.mulf %431, %417 : vector<8x128xf32>
    %c2_239 = arith.constant 2 : index
    %c2_240 = arith.constant 2 : index
    %433 = memref.load %arg1[%c2_239, %c2_240] : memref<3x8xf32, #tpu.memory_space<smem>>
    %434 = vector.broadcast %433 : f32 to vector<8x128xf32>
    %435 = arith.subf %432, %434 : vector<8x128xf32>
    %c18 = arith.constant 18 : index
    %c0_241 = arith.constant 0 : index
    %c0_242 = arith.constant 0 : index
    %436 = vector.load %arg5[%c18, %c0_241, %c0_242] : memref<64x8x128xf32, #tpu.memory_space<vmem>>, vector<1x8x128xf32>
    %437 = vector.shape_cast %436 : vector<1x8x128xf32> to vector<8x128xf32>
    %438 = vector.shape_cast %435 : vector<8x128xf32> to vector<1x8x128xf32>
    tpu.vector_store %arg5[%c18, %c0_241, %c0_242], %438 {strides = array<i32>} : memref<64x8x128xf32, #tpu.memory_space<vmem>>, vector<1x8x128xf32>,
    %c0_243 = arith.constant 0 : index
    %c3_244 = arith.constant 3 : index
    %439 = memref.load %arg1[%c0_243, %c3_244] : memref<3x8xf32, #tpu.memory_space<smem>>
    %440 = vector.broadcast %439 : f32 to vector<8x128xf32>
    %441 = arith.mulf %440, %417 : vector<8x128xf32>
    %c19 = arith.constant 19 : index
    %c0_245 = arith.constant 0 : index
    %c0_246 = arith.constant 0 : index
    %442 = vector.load %arg5[%c19, %c0_245, %c0_246] : memref<64x8x128xf32, #tpu.memory_space<vmem>>, vector<1x8x128xf32>
    %443 = vector.shape_cast %442 : vector<1x8x128xf32> to vector<8x128xf32>
    %444 = vector.shape_cast %441 : vector<8x128xf32> to vector<1x8x128xf32>
    tpu.vector_store %arg5[%c19, %c0_245, %c0_246], %444 {strides = array<i32>} : memref<64x8x128xf32, #tpu.memory_space<vmem>>, vector<1x8x128xf32>,
    %c0_247 = arith.constant 0 : index
    %c4_248 = arith.constant 4 : index
    %445 = memref.load %arg1[%c0_247, %c4_248] : memref<3x8xf32, #tpu.memory_space<smem>>
    %446 = vector.broadcast %445 : f32 to vector<8x128xf32>
    %447 = arith.mulf %446, %417 : vector<8x128xf32>
    %c20 = arith.constant 20 : index
    %c0_249 = arith.constant 0 : index
    %c0_250 = arith.constant 0 : index
    %448 = vector.load %arg5[%c20, %c0_249, %c0_250] : memref<64x8x128xf32, #tpu.memory_space<vmem>>, vector<1x8x128xf32>
    %449 = vector.shape_cast %448 : vector<1x8x128xf32> to vector<8x128xf32>
    %450 = vector.shape_cast %447 : vector<8x128xf32> to vector<1x8x128xf32>
    tpu.vector_store %arg5[%c20, %c0_249, %c0_250], %450 {strides = array<i32>} : memref<64x8x128xf32, #tpu.memory_space<vmem>>, vector<1x8x128xf32>,
    %c0_251 = arith.constant 0 : index
    %c5_252 = arith.constant 5 : index
    %451 = memref.load %arg1[%c0_251, %c5_252] : memref<3x8xf32, #tpu.memory_space<smem>>
    %452 = vector.broadcast %451 : f32 to vector<8x128xf32>
    %453 = arith.mulf %452, %417 : vector<8x128xf32>
    %c21 = arith.constant 21 : index
    %c0_253 = arith.constant 0 : index
    %c0_254 = arith.constant 0 : index
    %454 = vector.load %arg5[%c21, %c0_253, %c0_254] : memref<64x8x128xf32, #tpu.memory_space<vmem>>, vector<1x8x128xf32>
    %455 = vector.shape_cast %454 : vector<1x8x128xf32> to vector<8x128xf32>
    %456 = vector.shape_cast %453 : vector<8x128xf32> to vector<1x8x128xf32>
    tpu.vector_store %arg5[%c21, %c0_253, %c0_254], %456 {strides = array<i32>} : memref<64x8x128xf32, #tpu.memory_space<vmem>>, vector<1x8x128xf32>,
    %c0_255 = arith.constant 0 : index
    %c6_256 = arith.constant 6 : index
    %457 = memref.load %arg1[%c0_255, %c6_256] : memref<3x8xf32, #tpu.memory_space<smem>>
    %458 = vector.broadcast %457 : f32 to vector<8x128xf32>
    %459 = arith.mulf %458, %417 : vector<8x128xf32>
    %c22 = arith.constant 22 : index
    %c0_257 = arith.constant 0 : index
    %c0_258 = arith.constant 0 : index
    %460 = vector.load %arg5[%c22, %c0_257, %c0_258] : memref<64x8x128xf32, #tpu.memory_space<vmem>>, vector<1x8x128xf32>
    %461 = vector.shape_cast %460 : vector<1x8x128xf32> to vector<8x128xf32>
    %462 = vector.shape_cast %459 : vector<8x128xf32> to vector<1x8x128xf32>
    tpu.vector_store %arg5[%c22, %c0_257, %c0_258], %462 {strides = array<i32>} : memref<64x8x128xf32, #tpu.memory_space<vmem>>, vector<1x8x128xf32>,
    %c0_259 = arith.constant 0 : index
    %c7_260 = arith.constant 7 : index
    %463 = memref.load %arg1[%c0_259, %c7_260] : memref<3x8xf32, #tpu.memory_space<smem>>
    %464 = vector.broadcast %463 : f32 to vector<8x128xf32>
    %465 = arith.mulf %464, %417 : vector<8x128xf32>
    %c23 = arith.constant 23 : index
    %c0_261 = arith.constant 0 : index
    %c0_262 = arith.constant 0 : index
    %466 = vector.load %arg5[%c23, %c0_261, %c0_262] : memref<64x8x128xf32, #tpu.memory_space<vmem>>, vector<1x8x128xf32>
    %467 = vector.shape_cast %466 : vector<1x8x128xf32> to vector<8x128xf32>
    %468 = vector.shape_cast %465 : vector<8x128xf32> to vector<1x8x128xf32>
    tpu.vector_store %arg5[%c23, %c0_261, %c0_262], %468 {strides = array<i32>} : memref<64x8x128xf32, #tpu.memory_space<vmem>>, vector<1x8x128xf32>,
    %c1_263 = arith.constant 1 : index
    %c3_264 = arith.constant 3 : index
    %469 = memref.load %arg1[%c1_263, %c3_264] : memref<3x8xf32, #tpu.memory_space<smem>>
    %470 = vector.broadcast %469 : f32 to vector<8x128xf32>
    %471 = arith.mulf %470, %312 : vector<8x128xf32>
    %c0_265 = arith.constant 0 : index
    %c0_266 = arith.constant 0 : index
    %472 = memref.load %arg1[%c0_265, %c0_266] : memref<3x8xf32, #tpu.memory_space<smem>>
    %473 = vector.broadcast %472 : f32 to vector<8x128xf32>
    %474 = arith.mulf %473, %471 : vector<8x128xf32>
    %c24 = arith.constant 24 : index
    %c0_267 = arith.constant 0 : index
    %c0_268 = arith.constant 0 : index
    %475 = vector.load %arg5[%c24, %c0_267, %c0_268] : memref<64x8x128xf32, #tpu.memory_space<vmem>>, vector<1x8x128xf32>
    %476 = vector.shape_cast %475 : vector<1x8x128xf32> to vector<8x128xf32>
    %477 = vector.shape_cast %474 : vector<8x128xf32> to vector<1x8x128xf32>
    tpu.vector_store %arg5[%c24, %c0_267, %c0_268], %477 {strides = array<i32>} : memref<64x8x128xf32, #tpu.memory_space<vmem>>, vector<1x8x128xf32>,
    %c0_269 = arith.constant 0 : index
    %c1_270 = arith.constant 1 : index
    %478 = memref.load %arg1[%c0_269, %c1_270] : memref<3x8xf32, #tpu.memory_space<smem>>
    %479 = vector.broadcast %478 : f32 to vector<8x128xf32>
    %480 = arith.mulf %479, %471 : vector<8x128xf32>
    %c25 = arith.constant 25 : index
    %c0_271 = arith.constant 0 : index
    %c0_272 = arith.constant 0 : index
    %481 = vector.load %arg5[%c25, %c0_271, %c0_272] : memref<64x8x128xf32, #tpu.memory_space<vmem>>, vector<1x8x128xf32>
    %482 = vector.shape_cast %481 : vector<1x8x128xf32> to vector<8x128xf32>
    %483 = vector.shape_cast %480 : vector<8x128xf32> to vector<1x8x128xf32>
    tpu.vector_store %arg5[%c25, %c0_271, %c0_272], %483 {strides = array<i32>} : memref<64x8x128xf32, #tpu.memory_space<vmem>>, vector<1x8x128xf32>,
    %c0_273 = arith.constant 0 : index
    %c2_274 = arith.constant 2 : index
    %484 = memref.load %arg1[%c0_273, %c2_274] : memref<3x8xf32, #tpu.memory_space<smem>>
    %485 = vector.broadcast %484 : f32 to vector<8x128xf32>
    %486 = arith.mulf %485, %471 : vector<8x128xf32>
    %c26 = arith.constant 26 : index
    %c0_275 = arith.constant 0 : index
    %c0_276 = arith.constant 0 : index
    %487 = vector.load %arg5[%c26, %c0_275, %c0_276] : memref<64x8x128xf32, #tpu.memory_space<vmem>>, vector<1x8x128xf32>
    %488 = vector.shape_cast %487 : vector<1x8x128xf32> to vector<8x128xf32>
    %489 = vector.shape_cast %486 : vector<8x128xf32> to vector<1x8x128xf32>
    tpu.vector_store %arg5[%c26, %c0_275, %c0_276], %489 {strides = array<i32>} : memref<64x8x128xf32, #tpu.memory_space<vmem>>, vector<1x8x128xf32>,
    %c0_277 = arith.constant 0 : index
    %c3_278 = arith.constant 3 : index
    %490 = memref.load %arg1[%c0_277, %c3_278] : memref<3x8xf32, #tpu.memory_space<smem>>
    %491 = vector.broadcast %490 : f32 to vector<8x128xf32>
    %492 = arith.mulf %491, %471 : vector<8x128xf32>
    %c2_279 = arith.constant 2 : index
    %c3_280 = arith.constant 3 : index
    %493 = memref.load %arg1[%c2_279, %c3_280] : memref<3x8xf32, #tpu.memory_space<smem>>
    %494 = vector.broadcast %493 : f32 to vector<8x128xf32>
    %495 = arith.subf %492, %494 : vector<8x128xf32>
    %c27 = arith.constant 27 : index
    %c0_281 = arith.constant 0 : index
    %c0_282 = arith.constant 0 : index
    %496 = vector.load %arg5[%c27, %c0_281, %c0_282] : memref<64x8x128xf32, #tpu.memory_space<vmem>>, vector<1x8x128xf32>
    %497 = vector.shape_cast %496 : vector<1x8x128xf32> to vector<8x128xf32>
    %498 = vector.shape_cast %495 : vector<8x128xf32> to vector<1x8x128xf32>
    tpu.vector_store %arg5[%c27, %c0_281, %c0_282], %498 {strides = array<i32>} : memref<64x8x128xf32, #tpu.memory_space<vmem>>, vector<1x8x128xf32>,
    %c0_283 = arith.constant 0 : index
    %c4_284 = arith.constant 4 : index
    %499 = memref.load %arg1[%c0_283, %c4_284] : memref<3x8xf32, #tpu.memory_space<smem>>
    %500 = vector.broadcast %499 : f32 to vector<8x128xf32>
    %501 = arith.mulf %500, %471 : vector<8x128xf32>
    %c28 = arith.constant 28 : index
    %c0_285 = arith.constant 0 : index
    %c0_286 = arith.constant 0 : index
    %502 = vector.load %arg5[%c28, %c0_285, %c0_286] : memref<64x8x128xf32, #tpu.memory_space<vmem>>, vector<1x8x128xf32>
    %503 = vector.shape_cast %502 : vector<1x8x128xf32> to vector<8x128xf32>
    %504 = vector.shape_cast %501 : vector<8x128xf32> to vector<1x8x128xf32>
    tpu.vector_store %arg5[%c28, %c0_285, %c0_286], %504 {strides = array<i32>} : memref<64x8x128xf32, #tpu.memory_space<vmem>>, vector<1x8x128xf32>,
    %c0_287 = arith.constant 0 : index
    %c5_288 = arith.constant 5 : index
    %505 = memref.load %arg1[%c0_287, %c5_288] : memref<3x8xf32, #tpu.memory_space<smem>>
    %506 = vector.broadcast %505 : f32 to vector<8x128xf32>
    %507 = arith.mulf %506, %471 : vector<8x128xf32>
    %c29 = arith.constant 29 : index
    %c0_289 = arith.constant 0 : index
    %c0_290 = arith.constant 0 : index
    %508 = vector.load %arg5[%c29, %c0_289, %c0_290] : memref<64x8x128xf32, #tpu.memory_space<vmem>>, vector<1x8x128xf32>
    %509 = vector.shape_cast %508 : vector<1x8x128xf32> to vector<8x128xf32>
    %510 = vector.shape_cast %507 : vector<8x128xf32> to vector<1x8x128xf32>
    tpu.vector_store %arg5[%c29, %c0_289, %c0_290], %510 {strides = array<i32>} : memref<64x8x128xf32, #tpu.memory_space<vmem>>, vector<1x8x128xf32>,
    %c0_291 = arith.constant 0 : index
    %c6_292 = arith.constant 6 : index
    %511 = memref.load %arg1[%c0_291, %c6_292] : memref<3x8xf32, #tpu.memory_space<smem>>
    %512 = vector.broadcast %511 : f32 to vector<8x128xf32>
    %513 = arith.mulf %512, %471 : vector<8x128xf32>
    %c30 = arith.constant 30 : index
    %c0_293 = arith.constant 0 : index
    %c0_294 = arith.constant 0 : index
    %514 = vector.load %arg5[%c30, %c0_293, %c0_294] : memref<64x8x128xf32, #tpu.memory_space<vmem>>, vector<1x8x128xf32>
    %515 = vector.shape_cast %514 : vector<1x8x128xf32> to vector<8x128xf32>
    %516 = vector.shape_cast %513 : vector<8x128xf32> to vector<1x8x128xf32>
    tpu.vector_store %arg5[%c30, %c0_293, %c0_294], %516 {strides = array<i32>} : memref<64x8x128xf32, #tpu.memory_space<vmem>>, vector<1x8x128xf32>,
    %c0_295 = arith.constant 0 : index
    %c7_296 = arith.constant 7 : index
    %517 = memref.load %arg1[%c0_295, %c7_296] : memref<3x8xf32, #tpu.memory_space<smem>>
    %518 = vector.broadcast %517 : f32 to vector<8x128xf32>
    %519 = arith.mulf %518, %471 : vector<8x128xf32>
    %c31 = arith.constant 31 : index
    %c0_297 = arith.constant 0 : index
    %c0_298 = arith.constant 0 : index
    %520 = vector.load %arg5[%c31, %c0_297, %c0_298] : memref<64x8x128xf32, #tpu.memory_space<vmem>>, vector<1x8x128xf32>
    %521 = vector.shape_cast %520 : vector<1x8x128xf32> to vector<8x128xf32>
    %522 = vector.shape_cast %519 : vector<8x128xf32> to vector<1x8x128xf32>
    tpu.vector_store %arg5[%c31, %c0_297, %c0_298], %522 {strides = array<i32>} : memref<64x8x128xf32, #tpu.memory_space<vmem>>, vector<1x8x128xf32>,
    %c1_299 = arith.constant 1 : index
    %c4_300 = arith.constant 4 : index
    %523 = memref.load %arg1[%c1_299, %c4_300] : memref<3x8xf32, #tpu.memory_space<smem>>
    %524 = vector.broadcast %523 : f32 to vector<8x128xf32>
    %525 = arith.mulf %524, %312 : vector<8x128xf32>
    %c0_301 = arith.constant 0 : index
    %c0_302 = arith.constant 0 : index
    %526 = memref.load %arg1[%c0_301, %c0_302] : memref<3x8xf32, #tpu.memory_space<smem>>
    %527 = vector.broadcast %526 : f32 to vector<8x128xf32>
    %528 = arith.mulf %527, %525 : vector<8x128xf32>
    %c32 = arith.constant 32 : index
    %c0_303 = arith.constant 0 : index
    %c0_304 = arith.constant 0 : index
    %529 = vector.load %arg5[%c32, %c0_303, %c0_304] : memref<64x8x128xf32, #tpu.memory_space<vmem>>, vector<1x8x128xf32>
    %530 = vector.shape_cast %529 : vector<1x8x128xf32> to vector<8x128xf32>
    %531 = vector.shape_cast %528 : vector<8x128xf32> to vector<1x8x128xf32>
    tpu.vector_store %arg5[%c32, %c0_303, %c0_304], %531 {strides = array<i32>} : memref<64x8x128xf32, #tpu.memory_space<vmem>>, vector<1x8x128xf32>,
    %c0_305 = arith.constant 0 : index
    %c1_306 = arith.constant 1 : index
    %532 = memref.load %arg1[%c0_305, %c1_306] : memref<3x8xf32, #tpu.memory_space<smem>>
    %533 = vector.broadcast %532 : f32 to vector<8x128xf32>
    %534 = arith.mulf %533, %525 : vector<8x128xf32>
    %c33 = arith.constant 33 : index
    %c0_307 = arith.constant 0 : index
    %c0_308 = arith.constant 0 : index
    %535 = vector.load %arg5[%c33, %c0_307, %c0_308] : memref<64x8x128xf32, #tpu.memory_space<vmem>>, vector<1x8x128xf32>
    %536 = vector.shape_cast %535 : vector<1x8x128xf32> to vector<8x128xf32>
    %537 = vector.shape_cast %534 : vector<8x128xf32> to vector<1x8x128xf32>
    tpu.vector_store %arg5[%c33, %c0_307, %c0_308], %537 {strides = array<i32>} : memref<64x8x128xf32, #tpu.memory_space<vmem>>, vector<1x8x128xf32>,
    %c0_309 = arith.constant 0 : index
    %c2_310 = arith.constant 2 : index
    %538 = memref.load %arg1[%c0_309, %c2_310] : memref<3x8xf32, #tpu.memory_space<smem>>
    %539 = vector.broadcast %538 : f32 to vector<8x128xf32>
    %540 = arith.mulf %539, %525 : vector<8x128xf32>
    %c34 = arith.constant 34 : index
    %c0_311 = arith.constant 0 : index
    %c0_312 = arith.constant 0 : index
    %541 = vector.load %arg5[%c34, %c0_311, %c0_312] : memref<64x8x128xf32, #tpu.memory_space<vmem>>, vector<1x8x128xf32>
    %542 = vector.shape_cast %541 : vector<1x8x128xf32> to vector<8x128xf32>
    %543 = vector.shape_cast %540 : vector<8x128xf32> to vector<1x8x128xf32>
    tpu.vector_store %arg5[%c34, %c0_311, %c0_312], %543 {strides = array<i32>} : memref<64x8x128xf32, #tpu.memory_space<vmem>>, vector<1x8x128xf32>,
    %c0_313 = arith.constant 0 : index
    %c3_314 = arith.constant 3 : index
    %544 = memref.load %arg1[%c0_313, %c3_314] : memref<3x8xf32, #tpu.memory_space<smem>>
    %545 = vector.broadcast %544 : f32 to vector<8x128xf32>
    %546 = arith.mulf %545, %525 : vector<8x128xf32>
    %c35 = arith.constant 35 : index
    %c0_315 = arith.constant 0 : index
    %c0_316 = arith.constant 0 : index
    %547 = vector.load %arg5[%c35, %c0_315, %c0_316] : memref<64x8x128xf32, #tpu.memory_space<vmem>>, vector<1x8x128xf32>
    %548 = vector.shape_cast %547 : vector<1x8x128xf32> to vector<8x128xf32>
    %549 = vector.shape_cast %546 : vector<8x128xf32> to vector<1x8x128xf32>
    tpu.vector_store %arg5[%c35, %c0_315, %c0_316], %549 {strides = array<i32>} : memref<64x8x128xf32, #tpu.memory_space<vmem>>, vector<1x8x128xf32>,
    %c0_317 = arith.constant 0 : index
    %c4_318 = arith.constant 4 : index
    %550 = memref.load %arg1[%c0_317, %c4_318] : memref<3x8xf32, #tpu.memory_space<smem>>
    %551 = vector.broadcast %550 : f32 to vector<8x128xf32>
    %552 = arith.mulf %551, %525 : vector<8x128xf32>
    %c2_319 = arith.constant 2 : index
    %c4_320 = arith.constant 4 : index
    %553 = memref.load %arg1[%c2_319, %c4_320] : memref<3x8xf32, #tpu.memory_space<smem>>
    %554 = vector.broadcast %553 : f32 to vector<8x128xf32>
    %555 = arith.subf %552, %554 : vector<8x128xf32>
    %c36 = arith.constant 36 : index
    %c0_321 = arith.constant 0 : index
    %c0_322 = arith.constant 0 : index
    %556 = vector.load %arg5[%c36, %c0_321, %c0_322] : memref<64x8x128xf32, #tpu.memory_space<vmem>>, vector<1x8x128xf32>
    %557 = vector.shape_cast %556 : vector<1x8x128xf32> to vector<8x128xf32>
    %558 = vector.shape_cast %555 : vector<8x128xf32> to vector<1x8x128xf32>
    tpu.vector_store %arg5[%c36, %c0_321, %c0_322], %558 {strides = array<i32>} : memref<64x8x128xf32, #tpu.memory_space<vmem>>, vector<1x8x128xf32>,
    %c0_323 = arith.constant 0 : index
    %c5_324 = arith.constant 5 : index
    %559 = memref.load %arg1[%c0_323, %c5_324] : memref<3x8xf32, #tpu.memory_space<smem>>
    %560 = vector.broadcast %559 : f32 to vector<8x128xf32>
    %561 = arith.mulf %560, %525 : vector<8x128xf32>
    %c37 = arith.constant 37 : index
    %c0_325 = arith.constant 0 : index
    %c0_326 = arith.constant 0 : index
    %562 = vector.load %arg5[%c37, %c0_325, %c0_326] : memref<64x8x128xf32, #tpu.memory_space<vmem>>, vector<1x8x128xf32>
    %563 = vector.shape_cast %562 : vector<1x8x128xf32> to vector<8x128xf32>
    %564 = vector.shape_cast %561 : vector<8x128xf32> to vector<1x8x128xf32>
    tpu.vector_store %arg5[%c37, %c0_325, %c0_326], %564 {strides = array<i32>} : memref<64x8x128xf32, #tpu.memory_space<vmem>>, vector<1x8x128xf32>,
    %c0_327 = arith.constant 0 : index
    %c6_328 = arith.constant 6 : index
    %565 = memref.load %arg1[%c0_327, %c6_328] : memref<3x8xf32, #tpu.memory_space<smem>>
    %566 = vector.broadcast %565 : f32 to vector<8x128xf32>
    %567 = arith.mulf %566, %525 : vector<8x128xf32>
    %c38 = arith.constant 38 : index
    %c0_329 = arith.constant 0 : index
    %c0_330 = arith.constant 0 : index
    %568 = vector.load %arg5[%c38, %c0_329, %c0_330] : memref<64x8x128xf32, #tpu.memory_space<vmem>>, vector<1x8x128xf32>
    %569 = vector.shape_cast %568 : vector<1x8x128xf32> to vector<8x128xf32>
    %570 = vector.shape_cast %567 : vector<8x128xf32> to vector<1x8x128xf32>
    tpu.vector_store %arg5[%c38, %c0_329, %c0_330], %570 {strides = array<i32>} : memref<64x8x128xf32, #tpu.memory_space<vmem>>, vector<1x8x128xf32>,
    %c0_331 = arith.constant 0 : index
    %c7_332 = arith.constant 7 : index
    %571 = memref.load %arg1[%c0_331, %c7_332] : memref<3x8xf32, #tpu.memory_space<smem>>
    %572 = vector.broadcast %571 : f32 to vector<8x128xf32>
    %573 = arith.mulf %572, %525 : vector<8x128xf32>
    %c39 = arith.constant 39 : index
    %c0_333 = arith.constant 0 : index
    %c0_334 = arith.constant 0 : index
    %574 = vector.load %arg5[%c39, %c0_333, %c0_334] : memref<64x8x128xf32, #tpu.memory_space<vmem>>, vector<1x8x128xf32>
    %575 = vector.shape_cast %574 : vector<1x8x128xf32> to vector<8x128xf32>
    %576 = vector.shape_cast %573 : vector<8x128xf32> to vector<1x8x128xf32>
    tpu.vector_store %arg5[%c39, %c0_333, %c0_334], %576 {strides = array<i32>} : memref<64x8x128xf32, #tpu.memory_space<vmem>>, vector<1x8x128xf32>,
    %c1_335 = arith.constant 1 : index
    %c5_336 = arith.constant 5 : index
    %577 = memref.load %arg1[%c1_335, %c5_336] : memref<3x8xf32, #tpu.memory_space<smem>>
    %578 = vector.broadcast %577 : f32 to vector<8x128xf32>
    %579 = arith.mulf %578, %312 : vector<8x128xf32>
    %c0_337 = arith.constant 0 : index
    %c0_338 = arith.constant 0 : index
    %580 = memref.load %arg1[%c0_337, %c0_338] : memref<3x8xf32, #tpu.memory_space<smem>>
    %581 = vector.broadcast %580 : f32 to vector<8x128xf32>
    %582 = arith.mulf %581, %579 : vector<8x128xf32>
    %c40 = arith.constant 40 : index
    %c0_339 = arith.constant 0 : index
    %c0_340 = arith.constant 0 : index
    %583 = vector.load %arg5[%c40, %c0_339, %c0_340] : memref<64x8x128xf32, #tpu.memory_space<vmem>>, vector<1x8x128xf32>
    %584 = vector.shape_cast %583 : vector<1x8x128xf32> to vector<8x128xf32>
    %585 = vector.shape_cast %582 : vector<8x128xf32> to vector<1x8x128xf32>
    tpu.vector_store %arg5[%c40, %c0_339, %c0_340], %585 {strides = array<i32>} : memref<64x8x128xf32, #tpu.memory_space<vmem>>, vector<1x8x128xf32>,
    %c0_341 = arith.constant 0 : index
    %c1_342 = arith.constant 1 : index
    %586 = memref.load %arg1[%c0_341, %c1_342] : memref<3x8xf32, #tpu.memory_space<smem>>
    %587 = vector.broadcast %586 : f32 to vector<8x128xf32>
    %588 = arith.mulf %587, %579 : vector<8x128xf32>
    %c41 = arith.constant 41 : index
    %c0_343 = arith.constant 0 : index
    %c0_344 = arith.constant 0 : index
    %589 = vector.load %arg5[%c41, %c0_343, %c0_344] : memref<64x8x128xf32, #tpu.memory_space<vmem>>, vector<1x8x128xf32>
    %590 = vector.shape_cast %589 : vector<1x8x128xf32> to vector<8x128xf32>
    %591 = vector.shape_cast %588 : vector<8x128xf32> to vector<1x8x128xf32>
    tpu.vector_store %arg5[%c41, %c0_343, %c0_344], %591 {strides = array<i32>} : memref<64x8x128xf32, #tpu.memory_space<vmem>>, vector<1x8x128xf32>,
    %c0_345 = arith.constant 0 : index
    %c2_346 = arith.constant 2 : index
    %592 = memref.load %arg1[%c0_345, %c2_346] : memref<3x8xf32, #tpu.memory_space<smem>>
    %593 = vector.broadcast %592 : f32 to vector<8x128xf32>
    %594 = arith.mulf %593, %579 : vector<8x128xf32>
    %c42 = arith.constant 42 : index
    %c0_347 = arith.constant 0 : index
    %c0_348 = arith.constant 0 : index
    %595 = vector.load %arg5[%c42, %c0_347, %c0_348] : memref<64x8x128xf32, #tpu.memory_space<vmem>>, vector<1x8x128xf32>
    %596 = vector.shape_cast %595 : vector<1x8x128xf32> to vector<8x128xf32>
    %597 = vector.shape_cast %594 : vector<8x128xf32> to vector<1x8x128xf32>
    tpu.vector_store %arg5[%c42, %c0_347, %c0_348], %597 {strides = array<i32>} : memref<64x8x128xf32, #tpu.memory_space<vmem>>, vector<1x8x128xf32>,
    %c0_349 = arith.constant 0 : index
    %c3_350 = arith.constant 3 : index
    %598 = memref.load %arg1[%c0_349, %c3_350] : memref<3x8xf32, #tpu.memory_space<smem>>
    %599 = vector.broadcast %598 : f32 to vector<8x128xf32>
    %600 = arith.mulf %599, %579 : vector<8x128xf32>
    %c43 = arith.constant 43 : index
    %c0_351 = arith.constant 0 : index
    %c0_352 = arith.constant 0 : index
    %601 = vector.load %arg5[%c43, %c0_351, %c0_352] : memref<64x8x128xf32, #tpu.memory_space<vmem>>, vector<1x8x128xf32>
    %602 = vector.shape_cast %601 : vector<1x8x128xf32> to vector<8x128xf32>
    %603 = vector.shape_cast %600 : vector<8x128xf32> to vector<1x8x128xf32>
    tpu.vector_store %arg5[%c43, %c0_351, %c0_352], %603 {strides = array<i32>} : memref<64x8x128xf32, #tpu.memory_space<vmem>>, vector<1x8x128xf32>,
    %c0_353 = arith.constant 0 : index
    %c4_354 = arith.constant 4 : index
    %604 = memref.load %arg1[%c0_353, %c4_354] : memref<3x8xf32, #tpu.memory_space<smem>>
    %605 = vector.broadcast %604 : f32 to vector<8x128xf32>
    %606 = arith.mulf %605, %579 : vector<8x128xf32>
    %c44 = arith.constant 44 : index
    %c0_355 = arith.constant 0 : index
    %c0_356 = arith.constant 0 : index
    %607 = vector.load %arg5[%c44, %c0_355, %c0_356] : memref<64x8x128xf32, #tpu.memory_space<vmem>>, vector<1x8x128xf32>
    %608 = vector.shape_cast %607 : vector<1x8x128xf32> to vector<8x128xf32>
    %609 = vector.shape_cast %606 : vector<8x128xf32> to vector<1x8x128xf32>
    tpu.vector_store %arg5[%c44, %c0_355, %c0_356], %609 {strides = array<i32>} : memref<64x8x128xf32, #tpu.memory_space<vmem>>, vector<1x8x128xf32>,
    %c0_357 = arith.constant 0 : index
    %c5_358 = arith.constant 5 : index
    %610 = memref.load %arg1[%c0_357, %c5_358] : memref<3x8xf32, #tpu.memory_space<smem>>
    %611 = vector.broadcast %610 : f32 to vector<8x128xf32>
    %612 = arith.mulf %611, %579 : vector<8x128xf32>
    %c2_359 = arith.constant 2 : index
    %c5_360 = arith.constant 5 : index
    %613 = memref.load %arg1[%c2_359, %c5_360] : memref<3x8xf32, #tpu.memory_space<smem>>
    %614 = vector.broadcast %613 : f32 to vector<8x128xf32>
    %615 = arith.subf %612, %614 : vector<8x128xf32>
    %c45 = arith.constant 45 : index
    %c0_361 = arith.constant 0 : index
    %c0_362 = arith.constant 0 : index
    %616 = vector.load %arg5[%c45, %c0_361, %c0_362] : memref<64x8x128xf32, #tpu.memory_space<vmem>>, vector<1x8x128xf32>
    %617 = vector.shape_cast %616 : vector<1x8x128xf32> to vector<8x128xf32>
    %618 = vector.shape_cast %615 : vector<8x128xf32> to vector<1x8x128xf32>
    tpu.vector_store %arg5[%c45, %c0_361, %c0_362], %618 {strides = array<i32>} : memref<64x8x128xf32, #tpu.memory_space<vmem>>, vector<1x8x128xf32>,
    %c0_363 = arith.constant 0 : index
    %c6_364 = arith.constant 6 : index
    %619 = memref.load %arg1[%c0_363, %c6_364] : memref<3x8xf32, #tpu.memory_space<smem>>
    %620 = vector.broadcast %619 : f32 to vector<8x128xf32>
    %621 = arith.mulf %620, %579 : vector<8x128xf32>
    %c46 = arith.constant 46 : index
    %c0_365 = arith.constant 0 : index
    %c0_366 = arith.constant 0 : index
    %622 = vector.load %arg5[%c46, %c0_365, %c0_366] : memref<64x8x128xf32, #tpu.memory_space<vmem>>, vector<1x8x128xf32>
    %623 = vector.shape_cast %622 : vector<1x8x128xf32> to vector<8x128xf32>
    %624 = vector.shape_cast %621 : vector<8x128xf32> to vector<1x8x128xf32>
    tpu.vector_store %arg5[%c46, %c0_365, %c0_366], %624 {strides = array<i32>} : memref<64x8x128xf32, #tpu.memory_space<vmem>>, vector<1x8x128xf32>,
    %c0_367 = arith.constant 0 : index
    %c7_368 = arith.constant 7 : index
    %625 = memref.load %arg1[%c0_367, %c7_368] : memref<3x8xf32, #tpu.memory_space<smem>>
    %626 = vector.broadcast %625 : f32 to vector<8x128xf32>
    %627 = arith.mulf %626, %579 : vector<8x128xf32>
    %c47 = arith.constant 47 : index
    %c0_369 = arith.constant 0 : index
    %c0_370 = arith.constant 0 : index
    %628 = vector.load %arg5[%c47, %c0_369, %c0_370] : memref<64x8x128xf32, #tpu.memory_space<vmem>>, vector<1x8x128xf32>
    %629 = vector.shape_cast %628 : vector<1x8x128xf32> to vector<8x128xf32>
    %630 = vector.shape_cast %627 : vector<8x128xf32> to vector<1x8x128xf32>
    tpu.vector_store %arg5[%c47, %c0_369, %c0_370], %630 {strides = array<i32>} : memref<64x8x128xf32, #tpu.memory_space<vmem>>, vector<1x8x128xf32>,
    %c1_371 = arith.constant 1 : index
    %c6_372 = arith.constant 6 : index
    %631 = memref.load %arg1[%c1_371, %c6_372] : memref<3x8xf32, #tpu.memory_space<smem>>
    %632 = vector.broadcast %631 : f32 to vector<8x128xf32>
    %633 = arith.mulf %632, %312 : vector<8x128xf32>
    %c0_373 = arith.constant 0 : index
    %c0_374 = arith.constant 0 : index
    %634 = memref.load %arg1[%c0_373, %c0_374] : memref<3x8xf32, #tpu.memory_space<smem>>
    %635 = vector.broadcast %634 : f32 to vector<8x128xf32>
    %636 = arith.mulf %635, %633 : vector<8x128xf32>
    %c48 = arith.constant 48 : index
    %c0_375 = arith.constant 0 : index
    %c0_376 = arith.constant 0 : index
    %637 = vector.load %arg5[%c48, %c0_375, %c0_376] : memref<64x8x128xf32, #tpu.memory_space<vmem>>, vector<1x8x128xf32>
    %638 = vector.shape_cast %637 : vector<1x8x128xf32> to vector<8x128xf32>
    %639 = vector.shape_cast %636 : vector<8x128xf32> to vector<1x8x128xf32>
    tpu.vector_store %arg5[%c48, %c0_375, %c0_376], %639 {strides = array<i32>} : memref<64x8x128xf32, #tpu.memory_space<vmem>>, vector<1x8x128xf32>,
    %c0_377 = arith.constant 0 : index
    %c1_378 = arith.constant 1 : index
    %640 = memref.load %arg1[%c0_377, %c1_378] : memref<3x8xf32, #tpu.memory_space<smem>>
    %641 = vector.broadcast %640 : f32 to vector<8x128xf32>
    %642 = arith.mulf %641, %633 : vector<8x128xf32>
    %c49 = arith.constant 49 : index
    %c0_379 = arith.constant 0 : index
    %c0_380 = arith.constant 0 : index
    %643 = vector.load %arg5[%c49, %c0_379, %c0_380] : memref<64x8x128xf32, #tpu.memory_space<vmem>>, vector<1x8x128xf32>
    %644 = vector.shape_cast %643 : vector<1x8x128xf32> to vector<8x128xf32>
    %645 = vector.shape_cast %642 : vector<8x128xf32> to vector<1x8x128xf32>
    tpu.vector_store %arg5[%c49, %c0_379, %c0_380], %645 {strides = array<i32>} : memref<64x8x128xf32, #tpu.memory_space<vmem>>, vector<1x8x128xf32>,
    %c0_381 = arith.constant 0 : index
    %c2_382 = arith.constant 2 : index
    %646 = memref.load %arg1[%c0_381, %c2_382] : memref<3x8xf32, #tpu.memory_space<smem>>
    %647 = vector.broadcast %646 : f32 to vector<8x128xf32>
    %648 = arith.mulf %647, %633 : vector<8x128xf32>
    %c50 = arith.constant 50 : index
    %c0_383 = arith.constant 0 : index
    %c0_384 = arith.constant 0 : index
    %649 = vector.load %arg5[%c50, %c0_383, %c0_384] : memref<64x8x128xf32, #tpu.memory_space<vmem>>, vector<1x8x128xf32>
    %650 = vector.shape_cast %649 : vector<1x8x128xf32> to vector<8x128xf32>
    %651 = vector.shape_cast %648 : vector<8x128xf32> to vector<1x8x128xf32>
    tpu.vector_store %arg5[%c50, %c0_383, %c0_384], %651 {strides = array<i32>} : memref<64x8x128xf32, #tpu.memory_space<vmem>>, vector<1x8x128xf32>,
    %c0_385 = arith.constant 0 : index
    %c3_386 = arith.constant 3 : index
    %652 = memref.load %arg1[%c0_385, %c3_386] : memref<3x8xf32, #tpu.memory_space<smem>>
    %653 = vector.broadcast %652 : f32 to vector<8x128xf32>
    %654 = arith.mulf %653, %633 : vector<8x128xf32>
    %c51 = arith.constant 51 : index
    %c0_387 = arith.constant 0 : index
    %c0_388 = arith.constant 0 : index
    %655 = vector.load %arg5[%c51, %c0_387, %c0_388] : memref<64x8x128xf32, #tpu.memory_space<vmem>>, vector<1x8x128xf32>
    %656 = vector.shape_cast %655 : vector<1x8x128xf32> to vector<8x128xf32>
    %657 = vector.shape_cast %654 : vector<8x128xf32> to vector<1x8x128xf32>
    tpu.vector_store %arg5[%c51, %c0_387, %c0_388], %657 {strides = array<i32>} : memref<64x8x128xf32, #tpu.memory_space<vmem>>, vector<1x8x128xf32>,
    %c0_389 = arith.constant 0 : index
    %c4_390 = arith.constant 4 : index
    %658 = memref.load %arg1[%c0_389, %c4_390] : memref<3x8xf32, #tpu.memory_space<smem>>
    %659 = vector.broadcast %658 : f32 to vector<8x128xf32>
    %660 = arith.mulf %659, %633 : vector<8x128xf32>
    %c52 = arith.constant 52 : index
    %c0_391 = arith.constant 0 : index
    %c0_392 = arith.constant 0 : index
    %661 = vector.load %arg5[%c52, %c0_391, %c0_392] : memref<64x8x128xf32, #tpu.memory_space<vmem>>, vector<1x8x128xf32>
    %662 = vector.shape_cast %661 : vector<1x8x128xf32> to vector<8x128xf32>
    %663 = vector.shape_cast %660 : vector<8x128xf32> to vector<1x8x128xf32>
    tpu.vector_store %arg5[%c52, %c0_391, %c0_392], %663 {strides = array<i32>} : memref<64x8x128xf32, #tpu.memory_space<vmem>>, vector<1x8x128xf32>,
    %c0_393 = arith.constant 0 : index
    %c5_394 = arith.constant 5 : index
    %664 = memref.load %arg1[%c0_393, %c5_394] : memref<3x8xf32, #tpu.memory_space<smem>>
    %665 = vector.broadcast %664 : f32 to vector<8x128xf32>
    %666 = arith.mulf %665, %633 : vector<8x128xf32>
    %c53 = arith.constant 53 : index
    %c0_395 = arith.constant 0 : index
    %c0_396 = arith.constant 0 : index
    %667 = vector.load %arg5[%c53, %c0_395, %c0_396] : memref<64x8x128xf32, #tpu.memory_space<vmem>>, vector<1x8x128xf32>
    %668 = vector.shape_cast %667 : vector<1x8x128xf32> to vector<8x128xf32>
    %669 = vector.shape_cast %666 : vector<8x128xf32> to vector<1x8x128xf32>
    tpu.vector_store %arg5[%c53, %c0_395, %c0_396], %669 {strides = array<i32>} : memref<64x8x128xf32, #tpu.memory_space<vmem>>, vector<1x8x128xf32>,
    %c0_397 = arith.constant 0 : index
    %c6_398 = arith.constant 6 : index
    %670 = memref.load %arg1[%c0_397, %c6_398] : memref<3x8xf32, #tpu.memory_space<smem>>
    %671 = vector.broadcast %670 : f32 to vector<8x128xf32>
    %672 = arith.mulf %671, %633 : vector<8x128xf32>
    %c2_399 = arith.constant 2 : index
    %c6_400 = arith.constant 6 : index
    %673 = memref.load %arg1[%c2_399, %c6_400] : memref<3x8xf32, #tpu.memory_space<smem>>
    %674 = vector.broadcast %673 : f32 to vector<8x128xf32>
    %675 = arith.subf %672, %674 : vector<8x128xf32>
    %c54 = arith.constant 54 : index
    %c0_401 = arith.constant 0 : index
    %c0_402 = arith.constant 0 : index
    %676 = vector.load %arg5[%c54, %c0_401, %c0_402] : memref<64x8x128xf32, #tpu.memory_space<vmem>>, vector<1x8x128xf32>
    %677 = vector.shape_cast %676 : vector<1x8x128xf32> to vector<8x128xf32>
    %678 = vector.shape_cast %675 : vector<8x128xf32> to vector<1x8x128xf32>
    tpu.vector_store %arg5[%c54, %c0_401, %c0_402], %678 {strides = array<i32>} : memref<64x8x128xf32, #tpu.memory_space<vmem>>, vector<1x8x128xf32>,
    %c0_403 = arith.constant 0 : index
    %c7_404 = arith.constant 7 : index
    %679 = memref.load %arg1[%c0_403, %c7_404] : memref<3x8xf32, #tpu.memory_space<smem>>
    %680 = vector.broadcast %679 : f32 to vector<8x128xf32>
    %681 = arith.mulf %680, %633 : vector<8x128xf32>
    %c55 = arith.constant 55 : index
    %c0_405 = arith.constant 0 : index
    %c0_406 = arith.constant 0 : index
    %682 = vector.load %arg5[%c55, %c0_405, %c0_406] : memref<64x8x128xf32, #tpu.memory_space<vmem>>, vector<1x8x128xf32>
    %683 = vector.shape_cast %682 : vector<1x8x128xf32> to vector<8x128xf32>
    %684 = vector.shape_cast %681 : vector<8x128xf32> to vector<1x8x128xf32>
    tpu.vector_store %arg5[%c55, %c0_405, %c0_406], %684 {strides = array<i32>} : memref<64x8x128xf32, #tpu.memory_space<vmem>>, vector<1x8x128xf32>,
    %c1_407 = arith.constant 1 : index
    %c7_408 = arith.constant 7 : index
    %685 = memref.load %arg1[%c1_407, %c7_408] : memref<3x8xf32, #tpu.memory_space<smem>>
    %686 = vector.broadcast %685 : f32 to vector<8x128xf32>
    %687 = arith.mulf %686, %312 : vector<8x128xf32>
    %c0_409 = arith.constant 0 : index
    %c0_410 = arith.constant 0 : index
    %688 = memref.load %arg1[%c0_409, %c0_410] : memref<3x8xf32, #tpu.memory_space<smem>>
    %689 = vector.broadcast %688 : f32 to vector<8x128xf32>
    %690 = arith.mulf %689, %687 : vector<8x128xf32>
    %c56 = arith.constant 56 : index
    %c0_411 = arith.constant 0 : index
    %c0_412 = arith.constant 0 : index
    %691 = vector.load %arg5[%c56, %c0_411, %c0_412] : memref<64x8x128xf32, #tpu.memory_space<vmem>>, vector<1x8x128xf32>
    %692 = vector.shape_cast %691 : vector<1x8x128xf32> to vector<8x128xf32>
    %693 = vector.shape_cast %690 : vector<8x128xf32> to vector<1x8x128xf32>
    tpu.vector_store %arg5[%c56, %c0_411, %c0_412], %693 {strides = array<i32>} : memref<64x8x128xf32, #tpu.memory_space<vmem>>, vector<1x8x128xf32>,
    %c0_413 = arith.constant 0 : index
    %c1_414 = arith.constant 1 : index
    %694 = memref.load %arg1[%c0_413, %c1_414] : memref<3x8xf32, #tpu.memory_space<smem>>
    %695 = vector.broadcast %694 : f32 to vector<8x128xf32>
    %696 = arith.mulf %695, %687 : vector<8x128xf32>
    %c57 = arith.constant 57 : index
    %c0_415 = arith.constant 0 : index
    %c0_416 = arith.constant 0 : index
    %697 = vector.load %arg5[%c57, %c0_415, %c0_416] : memref<64x8x128xf32, #tpu.memory_space<vmem>>, vector<1x8x128xf32>
    %698 = vector.shape_cast %697 : vector<1x8x128xf32> to vector<8x128xf32>
    %699 = vector.shape_cast %696 : vector<8x128xf32> to vector<1x8x128xf32>
    tpu.vector_store %arg5[%c57, %c0_415, %c0_416], %699 {strides = array<i32>} : memref<64x8x128xf32, #tpu.memory_space<vmem>>, vector<1x8x128xf32>,
    %c0_417 = arith.constant 0 : index
    %c2_418 = arith.constant 2 : index
    %700 = memref.load %arg1[%c0_417, %c2_418] : memref<3x8xf32, #tpu.memory_space<smem>>
    %701 = vector.broadcast %700 : f32 to vector<8x128xf32>
    %702 = arith.mulf %701, %687 : vector<8x128xf32>
    %c58 = arith.constant 58 : index
    %c0_419 = arith.constant 0 : index
    %c0_420 = arith.constant 0 : index
    %703 = vector.load %arg5[%c58, %c0_419, %c0_420] : memref<64x8x128xf32, #tpu.memory_space<vmem>>, vector<1x8x128xf32>
    %704 = vector.shape_cast %703 : vector<1x8x128xf32> to vector<8x128xf32>
    %705 = vector.shape_cast %702 : vector<8x128xf32> to vector<1x8x128xf32>
    tpu.vector_store %arg5[%c58, %c0_419, %c0_420], %705 {strides = array<i32>} : memref<64x8x128xf32, #tpu.memory_space<vmem>>, vector<1x8x128xf32>,
    %c0_421 = arith.constant 0 : index
    %c3_422 = arith.constant 3 : index
    %706 = memref.load %arg1[%c0_421, %c3_422] : memref<3x8xf32, #tpu.memory_space<smem>>
    %707 = vector.broadcast %706 : f32 to vector<8x128xf32>
    %708 = arith.mulf %707, %687 : vector<8x128xf32>
    %c59 = arith.constant 59 : index
    %c0_423 = arith.constant 0 : index
    %c0_424 = arith.constant 0 : index
    %709 = vector.load %arg5[%c59, %c0_423, %c0_424] : memref<64x8x128xf32, #tpu.memory_space<vmem>>, vector<1x8x128xf32>
    %710 = vector.shape_cast %709 : vector<1x8x128xf32> to vector<8x128xf32>
    %711 = vector.shape_cast %708 : vector<8x128xf32> to vector<1x8x128xf32>
    tpu.vector_store %arg5[%c59, %c0_423, %c0_424], %711 {strides = array<i32>} : memref<64x8x128xf32, #tpu.memory_space<vmem>>, vector<1x8x128xf32>,
    %c0_425 = arith.constant 0 : index
    %c4_426 = arith.constant 4 : index
    %712 = memref.load %arg1[%c0_425, %c4_426] : memref<3x8xf32, #tpu.memory_space<smem>>
    %713 = vector.broadcast %712 : f32 to vector<8x128xf32>
    %714 = arith.mulf %713, %687 : vector<8x128xf32>
    %c60 = arith.constant 60 : index
    %c0_427 = arith.constant 0 : index
    %c0_428 = arith.constant 0 : index
    %715 = vector.load %arg5[%c60, %c0_427, %c0_428] : memref<64x8x128xf32, #tpu.memory_space<vmem>>, vector<1x8x128xf32>
    %716 = vector.shape_cast %715 : vector<1x8x128xf32> to vector<8x128xf32>
    %717 = vector.shape_cast %714 : vector<8x128xf32> to vector<1x8x128xf32>
    tpu.vector_store %arg5[%c60, %c0_427, %c0_428], %717 {strides = array<i32>} : memref<64x8x128xf32, #tpu.memory_space<vmem>>, vector<1x8x128xf32>,
    %c0_429 = arith.constant 0 : index
    %c5_430 = arith.constant 5 : index
    %718 = memref.load %arg1[%c0_429, %c5_430] : memref<3x8xf32, #tpu.memory_space<smem>>
    %719 = vector.broadcast %718 : f32 to vector<8x128xf32>
    %720 = arith.mulf %719, %687 : vector<8x128xf32>
    %c61 = arith.constant 61 : index
    %c0_431 = arith.constant 0 : index
    %c0_432 = arith.constant 0 : index
    %721 = vector.load %arg5[%c61, %c0_431, %c0_432] : memref<64x8x128xf32, #tpu.memory_space<vmem>>, vector<1x8x128xf32>
    %722 = vector.shape_cast %721 : vector<1x8x128xf32> to vector<8x128xf32>
    %723 = vector.shape_cast %720 : vector<8x128xf32> to vector<1x8x128xf32>
    tpu.vector_store %arg5[%c61, %c0_431, %c0_432], %723 {strides = array<i32>} : memref<64x8x128xf32, #tpu.memory_space<vmem>>, vector<1x8x128xf32>,
    %c0_433 = arith.constant 0 : index
    %c6_434 = arith.constant 6 : index
    %724 = memref.load %arg1[%c0_433, %c6_434] : memref<3x8xf32, #tpu.memory_space<smem>>
    %725 = vector.broadcast %724 : f32 to vector<8x128xf32>
    %726 = arith.mulf %725, %687 : vector<8x128xf32>
    %c62 = arith.constant 62 : index
    %c0_435 = arith.constant 0 : index
    %c0_436 = arith.constant 0 : index
    %727 = vector.load %arg5[%c62, %c0_435, %c0_436] : memref<64x8x128xf32, #tpu.memory_space<vmem>>, vector<1x8x128xf32>
    %728 = vector.shape_cast %727 : vector<1x8x128xf32> to vector<8x128xf32>
    %729 = vector.shape_cast %726 : vector<8x128xf32> to vector<1x8x128xf32>
    tpu.vector_store %arg5[%c62, %c0_435, %c0_436], %729 {strides = array<i32>} : memref<64x8x128xf32, #tpu.memory_space<vmem>>, vector<1x8x128xf32>,
    %c0_437 = arith.constant 0 : index
    %c7_438 = arith.constant 7 : index
    %730 = memref.load %arg1[%c0_437, %c7_438] : memref<3x8xf32, #tpu.memory_space<smem>>
    %731 = vector.broadcast %730 : f32 to vector<8x128xf32>
    %732 = arith.mulf %731, %687 : vector<8x128xf32>
    %c2_439 = arith.constant 2 : index
    %c7_440 = arith.constant 7 : index
    %733 = memref.load %arg1[%c2_439, %c7_440] : memref<3x8xf32, #tpu.memory_space<smem>>
    %734 = vector.broadcast %733 : f32 to vector<8x128xf32>
    %735 = arith.subf %732, %734 : vector<8x128xf32>
    %c63 = arith.constant 63 : index
    %c0_441 = arith.constant 0 : index
    %c0_442 = arith.constant 0 : index
    %736 = vector.load %arg5[%c63, %c0_441, %c0_442] : memref<64x8x128xf32, #tpu.memory_space<vmem>>, vector<1x8x128xf32>
    %737 = vector.shape_cast %736 : vector<1x8x128xf32> to vector<8x128xf32>
    %738 = vector.shape_cast %735 : vector<8x128xf32> to vector<1x8x128xf32>
    tpu.vector_store %arg5[%c63, %c0_441, %c0_442], %738 {strides = array<i32>} : memref<64x8x128xf32, #tpu.memory_space<vmem>>, vector<1x8x128xf32>,
    return
  }
  func.func @transform_0(%arg0: i32) -> (i32, i32) {
    %c0_i32 = arith.constant 0 : i32
    %c0_i32_0 = arith.constant 0 : i32
    %c0_i32_1 = arith.constant 0 : i32
    return %c0_i32, %c0_i32_0 : i32, i32
  }
  func.func @transform_1(%arg0: i32) -> (i32, i32) {
    %c0_i32 = arith.constant 0 : i32
    %c0_i32_0 = arith.constant 0 : i32
    return %arg0, %c0_i32 : i32, i32
  }
  func.func @transform_2(%arg0: i32) -> (i32, i32, i32) {
    %c0_i32 = arith.constant 0 : i32
    %c0_i32_0 = arith.constant 0 : i32
    %c0_i32_1 = arith.constant 0 : i32
    return %c0_i32, %arg0, %c0_i32_0 : i32, i32, i32
  }
  func.func @transform_3(%arg0: i32) -> (i32, i32, i32) {
    %c0_i32 = arith.constant 0 : i32
    %c0_i32_0 = arith.constant 0 : i32
    %c0_i32_1 = arith.constant 0 : i32
    return %c0_i32, %arg0, %c0_i32_0 : i32, i32, i32
  }
  func.func @transform_4(%arg0: i32) -> (i32, i32, i32) {
    %c0_i32 = arith.constant 0 : i32
    %c0_i32_0 = arith.constant 0 : i32
    %c0_i32_1 = arith.constant 0 : i32
    return %c0_i32, %arg0, %c0_i32_0 : i32, i32, i32
  }
}

</mosaic_0001>

<bundles_post_ra>
// kernel: tpu_custom_call.1
= control target key start
LH: loop header
LB: loop body
LE: loop exit
PB: predicated region body
PF: predicated region fallthrough
CT: control target
= control target key end

     0   :  { %10 = vsyncpa [#allocation5], 0  ;;  %s1758_s0 = inlined_call_operand.hbm [shape: f32[3,8], index: 0, kind: input, shape index: {}]   ;;  %s1759_s1 = inlined_call_operand.hbm [shape: f32[8,128], index: 1, kind: input, shape index: {}]   ;;  %s1760_s2 = inlined_call_operand.hbm [shape: f32[8,8,128], index: 2, kind: input, shape index: {}]   ;;  %s1761_s3 = inlined_call_operand.hbm [shape: f32[8,8,128], index: 3, kind: output, shape index: {0}]   ;;  %s1762_s4 = inlined_call_operand.hbm [shape: f32[64,8,128], index: 4, kind: output, shape index: {1}]  }
   0x1   :  { %11 = vsyncpa [#allocation3], 0 }
   0x2   :  { %12 = vsyncpa [#allocation8], 0 }
   0x3   :  { %13 = vsyncpa [#allocation4], 0 }
   0x4   :  { %14 = vsyncpa [#allocation11], 0  ;;  %s1161_s17 = scalar_lea.hbm %s1758_s0, 64 }
   0x5   :  { %p1162_p0 = scmp.ne.s32.totalorder %s1758_s0, %s1161_s17  ;;  %p1165_p1 = scmp.lt.u32.totalorder %s1161_s17, %s1758_s0 }
   0x7   :  { %p1167_p2 = pnand %p1165_p1, %p1162_p0 }
   0x9   :  { %1170 = shalt.err (!%p1167_p2)
}
   0xa   :  { %s1269_s22 = smov [#allocation2]   ;;  %s1270_s25 = smov [#allocation6]  }
   0xb   :  { %22 = dma.hbm_to_smem %s1758_s0, 64, %s1269_s22, [#allocation5]  }
   0xc   :  { %s29_s26 = sshll.u32 %s1270_s25, 4  ;;  %s1271_s27 = smov [#allocation7]   ;;  %s30_s26 = int_to_ptr.vmem [resolvable:$true] %s29_s26 }
   0xd   :  { %s38_s28 = sshll.u32 %s1271_s27, 4  ;;  %s1171_s5 = scalar_lea.hbm %s1759_s1, 128  ;;  %s39_s28 = int_to_ptr.vmem [resolvable:$true] %s38_s28 }
   0xe   :  { %p1172_p3 = scmp.ne.s32.totalorder %s1759_s1, %s1171_s5  ;;  %p1175_p4 = scmp.lt.u32.totalorder %s1171_s5, %s1759_s1 }
  0x10   :  { %p1177_p5 = pnand %p1175_p4, %p1172_p3 }
  0x12   :  { %1180 = shalt.err (!%p1177_p5)
}
  0x13   :  { %s1181_s0 = scalar_lea.vmem %s30_s26, 128  ;;  %p1186_p7 = scmp.lt.s32.totalorder %s30_s26, %s30_s26 }
  0x14   :  { %p1182_p6 = scmp.ne.s32.totalorder %s30_s26, %s1181_s0  ;;  %p1187_p8 = scmp.lt.s32.totalorder %s1181_s0, %s1181_s0 }
  0x16   :  { %p1188_p9 = por %p1187_p8, %p1186_p7 }
  0x18   :  { %p1189_p10 = pnand %p1188_p9, %p1182_p6 }
  0x1a   :  { %1192 = shalt.err (!%p1189_p10)
}
  0x1b   :  { %32 = dma.hbm_to_vmem [thread:$0]  %s1759_s1, 128, %s30_s26, [#allocation3]  }
  0x1c   :  { %s1193_s14 = scalar_lea.hbm %s1760_s2, 1024 }
  0x1d   :  { %p1194_p11 = scmp.ne.s32.totalorder %s1760_s2, %s1193_s14  ;;  %p1197_p12 = scmp.lt.u32.totalorder %s1193_s14, %s1760_s2 }
  0x1f   :  { %p1199_p13 = pnand %p1197_p12, %p1194_p11 }
  0x21   :  { %1202 = shalt.err (!%p1199_p13)
}
  0x22   :  { %s1203_s19 = scalar_lea.vmem %s39_s28, 1024  ;;  %p1208_p1 = scmp.lt.s32.totalorder %s39_s28, %s39_s28 }
  0x23   :  { %p1204_p0 = scmp.ne.s32.totalorder %s39_s28, %s1203_s19  ;;  %p1209_p2 = scmp.lt.s32.totalorder %s1203_s19, %s1203_s19 }
  0x25   :  { %p1210_p3 = por %p1209_p2, %p1208_p1 }
  0x27   :  { %p1211_p4 = pnand %p1210_p3, %p1204_p0 }
  0x29   :  { %1214 = shalt.err (!%p1211_p4)
}
  0x2a   :  { %s1272_s1 = smov 128   ;;  %s1273_s20 = smov 8  }
  0x2b   :  { %44 = dma.hbm_to_vmem [thread:$0]  %s1760_s2, 1024, %s39_s28, [#allocation8], %s1272_s1, %s1272_s1, %s1273_s20  }
  0x2c   :  { %1259 = dma.done.wait [#allocation5], 64  }
  0x2d   :  { %1260 = vsyncadd [#allocation5], 4294967232 }
  0x2e   :  { %1261 = dma.done.wait [#allocation3], 128  }
  0x2f   :  { %1262 = vsyncadd [#allocation3], 4294967168 }
  0x30   :  { %1263 = dma.done.wait [#allocation8], 1024  }
  0x31   :  { %1264 = vsyncadd [#allocation8], 4294966272 }
  0x32   :  { %54 = sfence }
  0x33   :  { %v55_v0 = vld [vmem:[#allocation6] sm:$0xff]  ;;  %v1274_v25 = vmov 683565275   ;;  %v1275_v27 = vmov 2475754826   ;;  %s1011_s2 = sld [smem:[#allocation2 + $0x1]] }
  0x34   :  { %v1346_v1 = vmul.f32 0.7, %v55_v0  ;;  %v1348_v2 = vmul.f32 0.5, %v55_v0  ;;  %v1276_v29 = vmov 2131351028   ;;  %s1012_s23 = sld [smem:[#allocation2 + $0x2]] }
  0x35   :  { %v1277_v31 = vmov 2102212464   ;;  %v1278_v33 = vmov 920167782   ;;  %v1279_v41 = vmov 1326507024  }
  0x36   :  { %v57_v3 = vand.u32 2147483647, %v1346_v1  ;;  %v60_v4 = vand.u32 2139095040, %v1346_v1  ;;  %v266_v5 = vand.u32 2147483647, %v1348_v2  ;;  %v269_v6 = vand.u32 2139095040, %v1348_v2 }
  0x37   :  { %s1013_s24 = sld [smem:[#allocation2 + $0x3]]  ;;  %s1014_s25 = sld [smem:[#allocation2 + $0x4]]  ;;  %vm59_vm14 = vcmp.lt.s32.totalorder %v1346_v1, 0 }
  0x38   :  { %v61_v7 = vshrl.u32 %v60_v4, 23  ;;  %v64_v8 = vand.u32 8388607, %v57_v3  ;;  %v270_v9 = vshrl.u32 %v269_v6, 23  ;;  %v273_v10 = vand.u32 8388607, %v266_v5 }
  0x39   :  { %s1015_s26 = sld [smem:[#allocation2 + $0x5]]  ;;  %vm58_vm15 = vcmp.le.f32.partialorder %v57_v3, 0.7853982  ;;  %s1016_s27 = sld [smem:[#allocation2 + $0x6]]  ;;  %v1444_v3 = vld [vmem:[#allocation7 + $0x28] sm:$0xff] }
  0x3a   :  { %v999_v11 = vadd.s32 4294967169, %v61_v7  ;;  %v1007_v12 = vadd.s32 4294967169, %v270_v9  ;;  %v65_v14 = vor.u32 8388608, %v64_v8  ;;  %v274_v15 = vor.u32 8388608, %v273_v10  ;;  %s1017_s28 = sld [smem:[#allocation2 + $0x7]]  ;;  %s1526_s29 = sld [smem:[#allocation2 + $0x81]] }
  0x3b   :  { %s1528_s30 = sld [smem:[#allocation2 + $0x101]]  ;;  %s1530_s5 = sld [smem:[#allocation2 + $0x82]] }
  0x3c   :  { %v67_v13 = vadd.s32 1, %v999_v11  ;;  %v276_v16 = vadd.s32 1, %v1007_v12  ;;  %v1358_v21 = vshll.u32 %v65_v14, 8  ;;  %v1360_v23 = vshll.u32 %v274_v15, 8  ;;  %s1532_s6 = sld [smem:[#allocation2 + $0x102]]  ;;  %s1534_s7 = sld [smem:[#allocation2 + $0x83]] }
  0x3d   :  { %s1536_s8 = sld [smem:[#allocation2 + $0x103]]  ;;  %s1538_s9 = sld [smem:[#allocation2 + $0x104]] }
  0x3e   :  { %vm68_vm0 = vcmp.gt.s32.totalorder %v67_v13, 0  ;;  %vm277_vm1 = vcmp.gt.s32.totalorder %v276_v16, 0  ;;  %s1540_s0 = sld [smem:[#allocation2 + $0x84]]  ;;  %s1542_s10 = sld [smem:[#allocation2 + $0x105]] }
  0x3f   :  { %v69_v17 = vsel %vm68_vm0, %v67_v13, 0  ;;  %v278_v20 = vsel %vm277_vm1, %v276_v16, 0  ;;  %vm268_vm0 = vcmp.lt.s32.totalorder %v1348_v2, 0  ;;  %vm1458_vm1 = vcmp.le.f32.partialorder %v266_v5, 0.7853982  ;;  %s1544_s11 = sld [smem:[#allocation2 + $0x106]] }
  0x40   :  { %v70_v18 = vshrl.u32 %v69_v17, 5  ;;  %v71_v19 = vand.u32 31, %v69_v17  ;;  %v280_v22 = vand.u32 31, %v278_v20  ;;  %v1362_v35 = vshrl.u32 %v278_v20, 5  ;;  %s1546_s12 = sld [smem:[#allocation2 + $0x107]]  ;;  %s1548_s13 = sld [smem:[#allocation2 + $0x85]] }
  0x41   :  { %s1550_s14 = sld [smem:[#allocation2 + $0x86]]  ;;  %s1552_s15 = sld [smem:[#allocation2 + $0x87]] }
  0x42   :  { %v72_v24 = vsub.s32 32, %v71_v19  ;;  %v74_v26 = vshll.u32 %v1274_v25, %v71_v19  ;;  %v77_v28 = vshll.u32 %v1275_v27, %v71_v19  ;;  %v80_v30 = vshll.u32 %v1276_v29, %v71_v19  ;;  %s1555_s16 = sld [smem:[#allocation2]]  ;;  %s1280_s17 = smov [#allocation9]  }
  0x43   :  { %v83_v32 = vshll.u32 %v1277_v31, %v71_v19  ;;  %v86_v34 = vshll.u32 %v1278_v33, %v71_v19  ;;  %vm89_vm2 = vcmp.lt.s32.totalorder %v70_v18, 1  ;;  %vm90_vm3 = vcmp.lt.s32.totalorder %v70_v18, 2  ;;  %s969_s18 = sshll.u32 %s1280_s17, 4  ;;  %s1621_s18 = int_to_ptr.vmem [resolvable:$true] %s969_s18 }
  0x44   :  { %v73_v36 = vshrl.u32 %v1274_v25, %v72_v24  ;;  %v75_v37 = vshrl.u32 %v1275_v27, %v72_v24  ;;  %v78_v38 = vshrl.u32 %v1276_v29, %v72_v24  ;;  %v81_v39 = vshrl.u32 %v1277_v31, %v72_v24  ;;  %s1215_s19 = scalar_lea.vmem %s1621_s18, 1024  ;;  %p1220_p6 = scmp.lt.s32.totalorder %s1621_s18, %s1621_s18 }
  0x45   :  { %v84_v40 = vshrl.u32 %v1278_v33, %v72_v24  ;;  %v87_v42 = vshrl.u32 %v1279_v41, %v72_v24  ;;  %vm92_vm4 = vcmp.lt.s32.totalorder %v70_v18, 4  ;;  %v281_v46 = vsub.s32 32, %v280_v22  ;;  %p1216_p5 = scmp.ne.s32.totalorder %s1621_s18, %s1215_s19  ;;  %p1221_p7 = scmp.lt.s32.totalorder %s1215_s19, %s1215_s19 }
  0x46   :  { %v76_v43 = vor.u32 %v75_v37, %v74_v26  ;;  %v79_v44 = vor.u32 %v78_v38, %v77_v28  ;;  %v82_v45 = vor.u32 %v81_v39, %v80_v30  ;;  %vm91_vm5 = vcmp.lt.s32.totalorder %v70_v18, 3 }
  0x47   :  { %v85_v47 = vor.u32 %v84_v40, %v83_v32  ;;  %v88_v48 = vor.u32 %v87_v42, %v86_v34  ;;  %v283_v49 = vshll.u32 %v1274_v25, %v280_v22  ;;  %v286_v57 = vshll.u32 %v1275_v27, %v280_v22  ;;  %p1222_p8 = por %p1221_p7, %p1220_p6 }
  0x48   :  { %v93_v50 = vsel %vm89_vm2, %v73_v36, %v76_v43  ;;  %v94_v51 = vsel %vm92_vm4, %v82_v45, 2102212464  ;;  %v97_v52 = vsel %vm89_vm2, %v76_v43, %v79_v44  ;;  %v101_v53 = vsel %vm89_vm2, %v79_v44, %v82_v45 }
  0x49   :  { %v95_v54 = vsel %vm91_vm5, %v79_v44, %v94_v51  ;;  %v98_v55 = vsel %vm92_vm4, %v85_v47, 920167782  ;;  %v102_v56 = vsel %vm92_vm4, %v88_v48, 1326507024  ;;  %v282_v60 = vshrl.u32 %v1274_v25, %v281_v46  ;;  %p1223_p9 = pnand %p1222_p8, %p1216_p5 }
  0x4a   :  { %v99_v58 = vsel %vm91_vm5, %v82_v45, %v98_v55  ;;  %v103_v59 = vsel %vm91_vm5, %v85_v47, %v102_v56  ;;  %v284_v61 = vshrl.u32 %v1275_v27, %v281_v46  ;;  %v96_v62 = vsel %vm90_vm3, %v93_v50, %v95_v54 }
  0x4b   :  { %v100_v63 = vsel %vm90_vm3, %v97_v52, %v99_v58  ;;  %v104_v0 = vsel %vm90_vm3, %v101_v53, %v103_v59  ;;  %v287_v4 = vshrl.u32 %v1276_v29, %v281_v46  ;;  %v289_v12 = vshll.u32 %v1276_v29, %v280_v22 }
  0x4c   :  { %v1371_v6 = vmul.u32.u64.low %v1358_v21, %v104_v0  ;;  %v1372_v7 = vmul.u32.u64.high %v1358_v21, %v104_v0, %v1371_v6  ;;  %v1375_v8 = vmul.u32.u64.low %v1358_v21, %v100_v63  ;;  %v1376_v9 = vmul.u32.u64.high %v1358_v21, %v100_v63, %v1375_v8 }
  0x4d   :  { %v285_v10 = vor.u32 %v284_v61, %v283_v49  ;;  %v288_v11 = vor.u32 %v287_v4, %v286_v57  ;;  %v290_v13 = vshrl.u32 %v1277_v31, %v281_v46  ;;  %v292_v14 = vshll.u32 %v1277_v31, %v280_v22 }
  0x4e   :  { %v293_v15 = vshrl.u32 %v1278_v33, %v281_v46  ;;  %v295_v16 = vshll.u32 %v1278_v33, %v280_v22  ;;  %v296_v17 = vshrl.u32 %v1279_v41, %v281_v46  ;;  %v112_v18 = vmul.u32 %v1358_v21, %v96_v62 }
  0x4f   :  { %v291_v19 = vor.u32 %v290_v13, %v289_v12  ;;  %vm298_vm6 = vcmp.lt.s32.totalorder %v1362_v35, 1  ;;  %vm299_vm7 = vcmp.lt.s32.totalorder %v1362_v35, 2  ;;  %vm114_vm8 = vc.u32 %v1372_v7, %v1375_v8 }
  0x50   :  { %v115_v20 = vadd.s32 1, %v1376_v9  ;;  %v294_v24 = vor.u32 %v293_v15, %v292_v14  ;;  %vm300_vm9 = vcmp.lt.s32.totalorder %v1362_v35, 3  ;;  %v297_v25 = vor.u32 %v296_v17, %v295_v16 }
  0x51   :  { %vm301_vm10 = vcmp.lt.s32.totalorder %v1362_v35, 4  ;;  %v302_v26 = vsel %vm298_vm6, %v282_v60, %v285_v10  ;;  %v306_v22 = vsel %vm298_vm6, %v285_v10, %v288_v11  ;;  %v310_v29 = vsel %vm298_vm6, %v288_v11, %v291_v19 }
  0x52   :  { %v116_v27 = vsel %vm114_vm8, %v115_v20, %v1376_v9  ;;  %v303_v21 = vsel %vm301_vm10, %v291_v19, 2102212464  ;;  %v307_v28 = vsel %vm301_vm10, %v294_v24, 920167782  ;;  %v311_v33 = vsel %vm301_vm10, %v297_v25, 1326507024 }
  0x53   :  { %v117_v30 = vadd.s32 %v116_v27, %v112_v18  ;;  %v304_v31 = vsel %vm300_vm9, %v288_v11, %v303_v21  ;;  %v308_v32 = vsel %vm300_vm9, %v291_v19, %v307_v28  ;;  %v312_v37 = vsel %vm300_vm9, %v294_v24, %v311_v33  ;;  %v1411_v9 = vld [vmem:[#allocation7 + $0x8] sm:$0xff]  ;;  %v1415_v11 = vld [vmem:[#allocation7 + $0x10] sm:$0xff]  ;;  %v1424_v19 = vld [vmem:[#allocation7 + $0x18] sm:$0xff] }
  0x54   :  { %v305_v34 = vsel %vm299_vm7, %v302_v26, %v304_v31  ;;  %v309_v36 = vsel %vm299_vm7, %v306_v22, %v308_v32  ;;  %v313_v39 = vsel %vm299_vm7, %v310_v29, %v312_v37  ;;  %v113_v57 = vadd.s32 %v1375_v8, %v1372_v7  ;;  %v1432_v33 = vld [vmem:[#allocation7 + $0x20] sm:$0xff] }
  0x55   :  { %v118_v38 = vadd.s32 536870912, %v117_v30  ;;  %v1393_v40 = vmul.u32.u64.low %v1360_v23, %v309_v36  ;;  %v1394_v41 = vmul.u32.u64.high %v1360_v23, %v309_v36, %v1393_v40  ;;  %v321_v45 = vmul.u32 %v1360_v23, %v305_v34 }
  0x56   :  { %v1397_v42 = vmul.u32.u64.low %v1360_v23, %v313_v39  ;;  %v1398_v43 = vmul.u32.u64.high %v1360_v23, %v313_v39, %v1397_v42  ;;  %v1413_v10 = vstv %s1011_s2  ;;  %v1417_v12 = vstv %s1012_s23 }
  0x57   :  { %v1400_v44 = vshrl.u32 %v118_v38, 30  ;;  %v324_v47 = vadd.s32 1, %v1394_v41  ;;  %v376_v16 = vmul.f32 %v1413_v10, %v1411_v9  ;;  %v381_v17 = vmul.f32 %v1417_v12, %v1415_v11 }
  0x58   :  { %vm323_vm11 = vc.u32 %v1398_v43, %v1393_v40  ;;  %v322_v18 = vadd.s32 %v1393_v40, %v1398_v43  ;;  %v1426_v20 = vstv %s1013_s24  ;;  %v1434_v34 = vstv %s1014_s25 }
  0x59   :  { %v120_v46 = vshll.u32 %v1400_v44, 30  ;;  %v325_v48 = vsel %vm323_vm11, %v324_v47, %v1394_v41  ;;  %v143_v25 = vsub.s32 4, %v1400_v44  ;;  %v382_v29 = vadd.f32 %v381_v17, %v376_v16 }
  0x5a   :  { %v326_v49 = vadd.s32 %v325_v48, %v321_v45  ;;  %v393_v42 = vmul.f32 %v1434_v34, %v1432_v33  ;;  %vm149_vm5 = vweird.f32 %v1346_v1  ;;  %vm358_vm9 = vweird.f32 %v1348_v2 }
  0x5b   :  { %v121_v35 = vsub.s32 %v117_v30, %v120_v46  ;;  %v387_v30 = vmul.f32 %v1426_v20, %v1424_v19  ;;  %v144_v37 = vsel %vm59_vm14, %v143_v25, %v1400_v44 }
  0x5c   :  { %v327_v51 = vadd.s32 536870912, %v326_v49  ;;  %v1442_v45 = vsel %vm58_vm15, 0, %v144_v37 }
  0x5d   :  { %v123_v50 = vsub.s32 0, %v121_v35  ;;  %v388_v41 = vadd.f32 %v387_v30, %v382_v29  ;;  %v253_v48 = vadd.s32 3, %v1442_v45 }
  0x5e   :  { %v1407_v53 = vshrl.u32 %v327_v51, 30 }
  0x5f   :  { %v1000_v52 = vmin.u32 %v123_v50, %v121_v35  ;;  %v394_v50 = vadd.f32 %v393_v42, %v388_v41 }
  0x60   :  { %v329_v55 = vshll.u32 %v1407_v53, 30 }
  0x61   :  { %v125_v54 = vclz %v1000_v52  ;;  %v1452_v52 = vld [vmem:[#allocation7 + $0x30] sm:$0xff] }
  0x62   :  { %v330_v56 = vsub.s32 %v326_v49, %v329_v55 }
  0x63   :  { %v1001_v23 = vadd.s32 4294967294, %v125_v54  ;;  %v1454_v54 = vstv %s1016_s27 }
  0x64   :  { %v332_v59 = vsub.s32 0, %v330_v56 }
  0x65   :  { %vm1002_vm12 = vcmp.lt.s32.totalorder %v1001_v23, 0 }
  0x66   :  { %v128_v58 = vsel %vm1002_vm12, 0, %v1001_v23  ;;  %v1008_v63 = vmin.u32 %v332_v59, %v330_v56  ;;  %v405_v59 = vmul.f32 %v1454_v54, %v1452_v52 }
  0x67   :  { %v129_v60 = vsub.s32 32, %v128_v58  ;;  %v130_v61 = vshll.u32 %v121_v35, %v128_v58  ;;  %v133_v62 = vsub.s32 4294967266, %v128_v58  ;;  %v1446_v35 = vstv %s1015_s26 }
  0x68   :  { %v334_v6 = vclz %v1008_v63  ;;  %v399_v51 = vmul.f32 %v1446_v35, %v1444_v3 }
  0x69   :  { %v131_v0 = vshrl.u32 %v113_v57, %v129_v60  ;;  %v134_v4 = vadd.s32 127, %v133_v62  ;;  %v1466_v60 = vld [vmem:[#allocation7 + $0x38] sm:$0xff]  ;;  %v352_v62 = vsub.s32 4, %v1407_v53 }
  0x6a   :  { %v1009_v13 = vadd.s32 4294967294, %v334_v6  ;;  %v400_v58 = vadd.f32 %v399_v51, %v394_v50 }
  0x6b   :  { %v132_v7 = vor.u32 %v131_v0, %v130_v61  ;;  %v135_v8 = vshll.u32 %v134_v4, 23  ;;  %v1468_v61 = vstv %s1017_s28 }
  0x6c   :  { %vm1010_vm13 = vcmp.lt.s32.totalorder %v1009_v13, 0  ;;  %v411_v0 = vmul.f32 %v1468_v61, %v1466_v60 }
  0x6d   :  { %v136_v14 = vor.u32 4788187, %v135_v8  ;;  %v139_v15 = vcvt.s32.f32 %v132_v7  ;;  %v337_v26 = vsel %vm1010_vm13, 0, %v1009_v13  ;;  %v406_v7 = vadd.f32 %v405_v59, %v400_v58 }
  0x6e   :  { %v338_v22 = vsub.s32 32, %v337_v26  ;;  %v339_v27 = vshll.u32 %v330_v56, %v337_v26  ;;  %v342_v21 = vsub.s32 4294967266, %v337_v26  ;;  %v254_v56 = vand.u32 3, %v253_v48 }
  0x6f   :  { %v137_v24 = vand.u32 2147483647, %v136_v14  ;;  %v353_v13 = vsel %vm268_vm0, %v352_v62, %v1407_v53 }
  0x70   :  { %v340_v31 = vshrl.u32 %v322_v18, %v338_v22  ;;  %v343_v32 = vadd.s32 127, %v342_v21  ;;  %vm259_vm2 = vcmp.eq.s32.totalorder %v254_v56, 2  ;;  %vm256_vm3 = vcmp.eq.s32.totalorder %v254_v56, 0 }
  0x71   :  { %v140_v28 = vmul.f32 %v139_v15, %v137_v24  ;;  %vm255_vm4 = vcmp.lt.s32.totalorder %v254_v56, 2  ;;  %v355_v17 = vsel %vm1458_vm1, 0, %v353_v13  ;;  %v412_v18 = vadd.f32 %v411_v0, %v406_v7 }
  0x72   :  { %v341_v38 = vor.u32 %v340_v31, %v339_v27  ;;  %v344_v39 = vshll.u32 %v343_v32, 23  ;;  %v359_v26 = vadd.s32 3, %v355_v17 }
  0x73   :  { %v141_v36 = vxor.u32 2147483648, %v140_v28 }
  0x74   :  { %v345_v46 = vor.u32 4788187, %v344_v39  ;;  %v348_v47 = vcvt.s32.f32 %v341_v38  ;;  %v360_v53 = vand.u32 3, %v359_v26 }
  0x75   :  { %v142_v40 = vsel %vm59_vm14, %v141_v36, %v140_v28 }
  0x76   :  { %v145_v43 = vsel %vm58_vm15, %v1346_v1, %v142_v40  ;;  %v346_v44 = vand.u32 2147483647, %v345_v46  ;;  %vm362_vm6 = vcmp.eq.s32.totalorder %v360_v53, 0  ;;  %vm365_vm7 = vcmp.eq.s32.totalorder %v360_v53, 2 }
  0x77   :  { %1123 = vcosq.f32 %v145_v43  ;;  %vm361_vm8 = vcmp.lt.s32.totalorder %v360_v53, 2 }
  0x78   :  { %1125 = vsinq.f32 %v145_v43  ;;  %v349_v49 = vmul.f32 %v348_v47, %v346_v44  ;;  %v150_v44 = vand.u32 3, %v1442_v45 }
  0x7a   :  { %v350_v23 = vxor.u32 2147483648, %v349_v49  ;;  %vm152_vm10 = vcmp.eq.s32.totalorder %v150_v44, 0  ;;  %vm155_vm11 = vcmp.eq.s32.totalorder %v150_v44, 2  ;;  %vm151_vm12 = vcmp.lt.s32.totalorder %v150_v44, 2 }
  0x7c   :  { %v351_v57 = vsel %vm268_vm0, %v350_v23, %v349_v49 }
  0x7d   :  { %v354_v5 = vsel %vm1458_vm1, %v1348_v2, %v351_v57 }
  0x7e   :  { %1127 = vcosq.f32 %v354_v5 }
  0x7f   :  { %1129 = vsinq.f32 %v354_v5 }
  0x81   :  { %v1124_v63 = vpop.eup %1123 }
  0x82   :  { %v1126_v4 = vpop.eup %1125  ;;  %v156_v6 = vxor.u32 2147483648, %v1124_v63 }
  0x83   :  { %v153_v8 = vxor.u32 2147483648, %v1126_v4 }
  0x84   :  { %v261_v14 = vsel %vm259_vm2, %v156_v6, %v1126_v4  ;;  %v157_v55 = vsel %vm155_vm11, %v156_v6, %v1126_v4 }
  0x85   :  { %v258_v15 = vsel %vm256_vm3, %v1124_v63, %v153_v8  ;;  %v154_v2 = vsel %vm152_vm10, %v1124_v63, %v153_v8 }
  0x86   :  { %v262_v16 = vsel %vm255_vm4, %v258_v15, %v261_v14  ;;  %v158_v57 = vsel %vm151_vm12, %v154_v2, %v157_v55 }
  0x87   :  { %v263_v24 = vsel %vm149_vm5, nan, %v262_v16  ;;  %v1498_v58 = vsel %vm149_vm5, nan, %v158_v57 }
  0x88   :  { %v264_v25 = vmul.f32 100.0, %v263_v24  ;;  %v1128_v27 = vpop.eup %1127 }
  0x89   :  { %v1130_v28 = vpop.eup %1129  ;;  %v366_v32 = vxor.u32 2147483648, %v1128_v27 }
  0x8a   :  { %v413_v22 = vsub.f32 %v264_v25, %v412_v18  ;;  %v363_v31 = vxor.u32 2147483648, %v1130_v28 }
  0x8b   :  { %v367_v38 = vsel %vm365_vm7, %v366_v32, %v1130_v28 }
  0x8c   :  { %v414_v21 = vmul.f32 0.02, %v413_v22  ;;  %v364_v37 = vsel %vm362_vm6, %v1128_v27, %v363_v31 }
  0x8d   :  { %v368_v39 = vsel %vm361_vm8, %v364_v37, %v367_v38 }
  0x8e   :  { %v415_v29 = vmul.f32 1.442695, %v414_v21  ;;  %v417_v30 = vsub.f32 0.0, %v414_v21  ;;  %v369_v41 = vsel %vm358_vm9, nan, %v368_v39 }
  0x8f   :  { %v370_v43 = vmul.f32 2.5, %v369_v41 }
  0x90   :  { %1131 = vpow2.f32 %v415_v29  ;;  %v418_v36 = vmul.f32 1.442695, %v417_v30 }
  0x91   :  { %v1490_v49 = vsub.f32 970.0, %v370_v43 }
  0x92   :  { %1133 = vpow2.f32 %v418_v36 }
  0x9a   :  { %v1132_v40 = vpop.eup %1131 }
  0x9c   :  { %v1134_v42 = vpop.eup %1133 }
  0x9d   :  { %v420_v46 = vsub.f32 %v1132_v40, %v1134_v42  ;;  %v1485_v47 = vadd.f32 %v1134_v42, %v1132_v40 }
  0x9f   :  { %v1488_v48 = vmul.f32 0.0005, %v420_v46 }
  0xa1   :  { %v424_v50 = vmul.f32 0.2, %v1488_v48  ;;  %v425_v56 = vsub.f32 0.0, %v1488_v48 }
  0xa3   :  { %v428_v51 = vsub.f32 1.0, %v424_v50  ;;  %v426_v45 = vmul.f32 %v425_v56, %v1490_v49 }
  0xa5   :  { %v429_v23 = vmul.f32 %v428_v51, %v1490_v49  ;;  %v427_v59 = vsub.f32 %v426_v45, %v1498_v58 }
  0xa7   :  { %1135 = vrcp.f32 %v429_v23 }
  0xb1   :  { %v1136_v62 = vpop.eup %1135 }
  0xb2   :  { %v431_v5 = vmul.f32 %v1136_v62, %v427_v59 }
  0xb4   :  { %v432_v0 = vsub.f32 0.0, %v431_v5 }
  0xb6   :  { %1137 = vtanh.f32 %v432_v0 }
  0xc0   :  { %v1138_v63 = vpop.eup %1137 }
  0xc1   :  { %v434_v4 = vmul.f32 0.2, %v1138_v63  ;;  %v437_v6 = vmul.f32 %v1138_v63, %v1138_v63 }
  0xc3   :  { %v438_v7 = vsub.f32 1.0, %v437_v6  ;;  %v435_v8 = vadd.f32 1.0, %v434_v4 }
  0xc5   :  { %v439_v13 = vmul.f32 0.2, %v438_v7  ;;  %v436_v15 = vmul.f32 %v435_v8, %v1488_v48 }
  0xc7   :  { %v440_v14 = vmul.f32 %v439_v13, %v1488_v48  ;;  %v441_v17 = vsub.f32 %v432_v0, %v436_v15 }
  0xc9   :  { %v444_v16 = vsub.f32 1.0, %v440_v14  ;;  %v442_v18 = vmul.f32 %v441_v17, %v1490_v49 }
  0xcb   :  { %v445_v1 = vmul.f32 %v444_v16, %v1490_v49  ;;  %v443_v24 = vsub.f32 %v442_v18, %v1498_v58 }
  0xcd   :  { %1139 = vrcp.f32 %v445_v1 }
  0xd7   :  { %v1140_v25 = vpop.eup %1139 }
  0xd8   :  { %v447_v26 = vmul.f32 %v1140_v25, %v443_v24 }
  0xda   :  { %v448_v22 = vsub.f32 %v432_v0, %v447_v26 }
  0xdc   :  { %1141 = vtanh.f32 %v448_v22 }
  0xe6   :  { %v1142_v27 = vpop.eup %1141 }
  0xe7   :  { %v450_v21 = vmul.f32 0.2, %v1142_v27  ;;  %v453_v28 = vmul.f32 %v1142_v27, %v1142_v27 }
  0xe9   :  { %v454_v53 = vsub.f32 1.0, %v453_v28  ;;  %v451_v29 = vadd.f32 1.0, %v450_v21 }
  0xeb   :  { %v455_v30 = vmul.f32 0.2, %v454_v53  ;;  %v452_v32 = vmul.f32 %v451_v29, %v1488_v48 }
  0xed   :  { %v456_v31 = vmul.f32 %v455_v30, %v1488_v48  ;;  %v457_v38 = vsub.f32 %v448_v22, %v452_v32 }
  0xef   :  { %v460_v36 = vsub.f32 1.0, %v456_v31  ;;  %v458_v39 = vmul.f32 %v457_v38, %v1490_v49 }
  0xf1   :  { %v461_v37 = vmul.f32 %v460_v36, %v1490_v49  ;;  %v459_v40 = vsub.f32 %v458_v39, %v1498_v58 }
  0xf3   :  { %1143 = vrcp.f32 %v461_v37 }
  0xfd   :  { %v1144_v41 = vpop.eup %1143 }
  0xfe   :  { %v463_v42 = vmul.f32 %v1144_v41, %v459_v40 }
 0x100   :  { %v464_v43 = vsub.f32 %v448_v22, %v463_v42 }
 0x102   :  { %1145 = vtanh.f32 %v464_v43 }
 0x10c   :  { %v1146_v46 = vpop.eup %1145 }
 0x10d   :  { %v466_v44 = vmul.f32 0.2, %v1146_v46  ;;  %v469_v50 = vmul.f32 %v1146_v46, %v1146_v46 }
 0x10f   :  { %v470_v51 = vsub.f32 1.0, %v469_v50  ;;  %v467_v2 = vadd.f32 1.0, %v466_v44 }
 0x111   :  { %v471_v55 = vmul.f32 0.2, %v470_v51  ;;  %v468_v56 = vmul.f32 %v467_v2, %v1488_v48  ;;  %v423_v51 = vmul.f32 1e-05, %v1485_v47  ;;  %v524_v2 = vstv %s1526_s29 }
 0x112   :  { %v568_v47 = vstv %s1542_s10 }
 0x113   :  { %v472_v23 = vmul.f32 %v471_v55, %v1488_v48  ;;  %v473_v59 = vsub.f32 %v464_v43, %v468_v56  ;;  %v534_v55 = vstv %s1530_s5 }
 0x115   :  { %v476_v57 = vsub.f32 1.0, %v472_v23  ;;  %v474_v62 = vmul.f32 %v473_v59, %v1490_v49  ;;  %v538_v23 = vstv %s1532_s6  ;;  %v558_v59 = vstv %s1538_s9 }
 0x117   :  { %v477_v45 = vmul.f32 %v476_v57, %v1490_v49  ;;  %v475_v5 = vsub.f32 %v474_v62, %v1498_v58 }
 0x119   :  { %1147 = vrcp.f32 %v477_v45  ;;  %v548_v45 = vstv %s1536_s8 }
 0x123   :  { %v1148_v0 = vpop.eup %1147 }
 0x124   :  { %v479_v63 = vmul.f32 %v1148_v0, %v475_v5  ;;  %v544_v5 = vstv %s1534_s7  ;;  %v554_v0 = vstv %s1540_s0 }
 0x126   :  { %v480_v4 = vsub.f32 %v464_v43, %v479_v63 }
 0x128   :  { %1149 = vtanh.f32 %v480_v4 }
 0x132   :  { %v1150_v6 = vpop.eup %1149 }
 0x133   :  { %v482_v7 = vmul.f32 0.2, %v1150_v6  ;;  %v485_v8 = vmul.f32 %v1150_v6, %v1150_v6  ;;  %v578_v6 = vstv %s1544_s11 }
 0x135   :  { %v486_v13 = vsub.f32 1.0, %v485_v8  ;;  %v483_v14 = vadd.f32 1.0, %v482_v7  ;;  %v588_v7 = vstv %s1546_s12  ;;  %v539_v8 = vmul.f32 %v538_v23, %v1415_v11 }
 0x136   :  { %v584_v11 = vstv %s1552_s15 }
 0x137   :  { %v487_v15 = vmul.f32 0.2, %v486_v13  ;;  %v484_v1 = vmul.f32 %v483_v14, %v1488_v48  ;;  %v549_v13 = vmul.f32 %v548_v45, %v1424_v19  ;;  %v564_v14 = vstv %s1548_s13 }
 0x138   :  { %v589_v19 = vmul.f32 %v588_v7, %v1466_v60 }
 0x139   :  { %v488_v16 = vmul.f32 %v487_v15, %v1488_v48  ;;  %v489_v24 = vsub.f32 %v480_v4, %v484_v1 }
 0x13b   :  { %v492_v17 = vsub.f32 1.0, %v488_v16  ;;  %v490_v25 = vmul.f32 %v489_v24, %v1490_v49  ;;  %v579_v24 = vmul.f32 %v578_v6, %v1452_v52 }
 0x13d   :  { %v493_v18 = vmul.f32 %v492_v17, %v1490_v49  ;;  %v491_v26 = vsub.f32 %v490_v25, %v1498_v58  ;;  %v569_v17 = vmul.f32 %v568_v47, %v1444_v3 }
 0x13f   :  { %1151 = vrcp.f32 %v493_v18  ;;  %v574_v18 = vstv %s1550_s14 }
 0x149   :  { %v1152_v22 = vpop.eup %1151 }
 0x14a   :  { %v495_v27 = vmul.f32 %v1152_v22, %v491_v26  ;;  %v1597_v22 = vstv %s1555_s16 }
 0x14c   :  { %v496_v21 = vsub.f32 %v480_v4, %v495_v27 }
 0x14e   :  { %1153 = vtanh.f32 %v496_v21 }
 0x158   :  { %v1154_v28 = vpop.eup %1153 }
 0x159   :  { %v498_v53 = vmul.f32 0.2, %v1154_v28  ;;  %v501_v29 = vmul.f32 %v1154_v28, %v1154_v28 }
 0x15b   :  { %v502_v30 = vsub.f32 1.0, %v501_v29  ;;  %v499_v31 = vadd.f32 1.0, %v498_v53 }
 0x15d   :  { %v503_v32 = vmul.f32 0.2, %v502_v30  ;;  %v500_v37 = vmul.f32 %v499_v31, %v1488_v48 }
 0x15f   :  { %v504_v36 = vmul.f32 %v503_v32, %v1488_v48  ;;  %v505_v40 = vsub.f32 %v496_v21, %v500_v37 }
 0x161   :  { %v508_v38 = vsub.f32 1.0, %v504_v36  ;;  %v506_v41 = vmul.f32 %v505_v40, %v1490_v49 }
 0x163   :  { %v509_v39 = vmul.f32 %v508_v38, %v1490_v49  ;;  %v507_v42 = vsub.f32 %v506_v41, %v1498_v58  ;;  %v528_v58 = vstv %s1528_s30 }
 0x164   :  { %v529_v62 = vmul.f32 %v528_v58, %v1411_v9  ;;  %v559_v9 = vmul.f32 %v558_v59, %v1432_v33 }
 0x165   :  { %1155 = vrcp.f32 %v509_v39 }
 0x16f   :  { %v1156_v43 = vpop.eup %1155 }
 0x170   :  { %v511_v46 = vmul.f32 %v1156_v43, %v507_v42 }
 0x172   :  { %v512_v44 = vsub.f32 %v496_v21, %v511_v46 }
 0x174   :  { %1157 = vtanh.f32 %v512_v44  ;;  %522 = vst [vmem:[#allocation9] sm:$0xff] %v512_v44 }
 0x17e   :  { %v1158_v50 = vpop.eup %1157 }
 0x17f   :  { %v514_v56 = vmul.f32 0.2, %v1158_v50  ;;  %v517_v57 = vmul.f32 %v1158_v50, %v1158_v50 }
 0x181   :  { %v515_v63 = vadd.f32 1.0, %v514_v56  ;;  %v518_v4 = vsub.f32 1.0, %v517_v57 }
 0x183   :  { %v516_v15 = vmul.f32 %v515_v63, %v1488_v48  ;;  %v519_v16 = vmul.f32 0.2, %v518_v4  ;;  %v521_v1 = vmul.f32 %v515_v63, %v423_v51 }
 0x185   :  { %v520_v25 = vmul.f32 %v519_v16, %v1488_v48  ;;  %v1594_v33 = vsub.f32 0.0, %v521_v1  ;;  %v525_v26 = vmul.f32 %v524_v2, %v516_v15  ;;  %v535_v27 = vmul.f32 %v534_v55, %v516_v15 }
 0x186   :  { %v545_v21 = vmul.f32 %v544_v5, %v516_v15  ;;  %v555_v3 = vmul.f32 %v554_v0, %v516_v15  ;;  %v565_v28 = vmul.f32 %v564_v14, %v516_v15  ;;  %v1600_v29 = vmul.f32 %v521_v1, %v1490_v49 }
 0x187   :  { %v593_v53 = vsub.f32 1.0, %v520_v25  ;;  %v530_v52 = vsub.f32 %v525_v26, %v529_v62  ;;  %v575_v30 = vmul.f32 %v574_v18, %v516_v15  ;;  %v540_v60 = vsub.f32 %v535_v27, %v539_v8 }
 0x188   :  { %v550_v31 = vsub.f32 %v545_v21, %v549_v13  ;;  %v560_v48 = vsub.f32 %v555_v3, %v559_v9  ;;  %v570_v32 = vsub.f32 %v565_v28, %v569_v17  ;;  %v585_v38 = vmul.f32 %v584_v11, %v516_v15 }
 0x189   :  { %v1605_v36 = vmul.f32 %v593_v53, %v1490_v49  ;;  %532 = vst [vmem:[#allocation9 + $0x8] sm:$0xff] %v530_v52  ;;  %v580_v37 = vsub.f32 %v575_v30, %v579_v24  ;;  %v644_v39 = vmul.f32 %v1594_v33, %v524_v2  ;;  %542 = vst [vmem:[#allocation9 + $0x10] sm:$0xff] %v540_v60 }
 0x18a   :  { %552 = vst [vmem:[#allocation9 + $0x18] sm:$0xff] %v550_v31  ;;  %562 = vst [vmem:[#allocation9 + $0x20] sm:$0xff] %v560_v48  ;;  %v690_v40 = vmul.f32 %v1594_v33, %v534_v55  ;;  %v736_v41 = vmul.f32 %v1594_v33, %v544_v5  ;;  %v1613_v42 = vmul.f32 %v1594_v33, %v554_v0 }
 0x18b   :  { %572 = vst [vmem:[#allocation9 + $0x28] sm:$0xff] %v570_v32  ;;  %v1616_v49 = vmul.f32 %v1594_v33, %v564_v14  ;;  %1159 = vrcp.f32 %v1605_v36  ;;  %582 = vst [vmem:[#allocation9 + $0x30] sm:$0xff] %v580_v37  ;;  %v590_v43 = vsub.f32 %v585_v38, %v589_v19  ;;  %v647_v46 = vmul.f32 %v644_v39, %v1597_v22 }
 0x18c   :  { %v652_v44 = vmul.f32 %v644_v39, %v1413_v10  ;;  %v660_v50 = vmul.f32 %v644_v39, %v1417_v12  ;;  %v665_v51 = vmul.f32 %v644_v39, %v1426_v20  ;;  %v670_v2 = vmul.f32 %v644_v39, %v1434_v34 }
 0x18d   :  { %v675_v55 = vmul.f32 %v644_v39, %v1446_v35  ;;  %592 = vst [vmem:[#allocation9 + $0x38] sm:$0xff] %v590_v43  ;;  %649 = vst [vmem:[#allocation10 + $0x40] sm:$0xff] %v647_v46  ;;  %v680_v57 = vmul.f32 %v644_v39, %v1454_v54  ;;  %v685_v62 = vmul.f32 %v644_v39, %v1468_v61 }
 0x18e   :  { %v655_v56 = vsub.f32 %v652_v44, %v528_v58  ;;  %v693_v5 = vmul.f32 %v690_v40, %v1597_v22  ;;  %662 = vst [vmem:[#allocation10 + $0x50] sm:$0xff] %v660_v50  ;;  %667 = vst [vmem:[#allocation10 + $0x58] sm:$0xff] %v665_v51  ;;  %v698_v0 = vmul.f32 %v690_v40, %v1413_v10 }
 0x18f   :  { %672 = vst [vmem:[#allocation10 + $0x60] sm:$0xff] %v670_v2  ;;  %677 = vst [vmem:[#allocation10 + $0x68] sm:$0xff] %v675_v55  ;;  %v703_v63 = vmul.f32 %v690_v40, %v1417_v12  ;;  %v711_v4 = vmul.f32 %v690_v40, %v1426_v20  ;;  %v716_v8 = vmul.f32 %v690_v40, %v1434_v34 }
 0x190   :  { %1226 = shalt.err (!%p1223_p9)
}
 0x191   :  { %s1227_s2 = scalar_lea.hbm %s1761_s3, 1024 }
 0x192   :  { %p1228_p10 = scmp.ne.s32.totalorder %s1761_s3, %s1227_s2  ;;  %p1231_p11 = scmp.lt.u32.totalorder %s1227_s2, %s1761_s3 }
 0x194   :  { %p1233_p12 = pnand %p1231_p11, %p1228_p10 }
 0x196   :  { %1236 = shalt.err (!%p1233_p12)
}
 0x197   :  { %975 = dma.vmem_to_hbm [thread:$0]  %s1621_s18, 1024, %s1761_s3, [#allocation4], %s1272_s1, %s1272_s1, %s1273_s20   ;;  %657 = vst [vmem:[#allocation10 + $0x48] sm:$0xff] %v655_v56  ;;  %682 = vst [vmem:[#allocation10 + $0x70] sm:$0xff] %v680_v57  ;;  %v721_v58 = vmul.f32 %v690_v40, %v1446_v35  ;;  %v726_v13 = vmul.f32 %v690_v40, %v1454_v54  ;;  %v731_v9 = vmul.f32 %v690_v40, %v1468_v61  ;;  %v1160_v32 = vpop.eup %1159  ;;  %v600_v46 = vsub.f32 0.0, %v1600_v29 }
 0x198   :  { %687 = vst [vmem:[#allocation10 + $0x78] sm:$0xff] %v685_v62  ;;  %695 = vst [vmem:[#allocation10 + $0x80] sm:$0xff] %v693_v5  ;;  %v739_v14 = vmul.f32 %v736_v41, %v1597_v22  ;;  %v706_v15 = vsub.f32 %v703_v63, %v538_v23  ;;  %v744_v16 = vmul.f32 %v736_v41, %v1413_v10  ;;  %s1281_s3 = smov [#allocation10]  }
 0x199   :  { %700 = vst [vmem:[#allocation10 + $0x88] sm:$0xff] %v698_v0  ;;  %713 = vst [vmem:[#allocation10 + $0x98] sm:$0xff] %v711_v4  ;;  %v749_v1 = vmul.f32 %v736_v41, %v1417_v12  ;;  %v754_v17 = vmul.f32 %v736_v41, %v1426_v20  ;;  %v762_v24 = vmul.f32 %v736_v41, %v1434_v34  ;;  %s981_s29 = sshll.u32 %s1281_s3, 4  ;;  %s982_s29 = int_to_ptr.vmem [resolvable:$true] %s981_s29 }
 0x19a   :  { %718 = vst [vmem:[#allocation10 + $0xa0] sm:$0xff] %v716_v8  ;;  %723 = vst [vmem:[#allocation10 + $0xa8] sm:$0xff] %v721_v58  ;;  %v767_v19 = vmul.f32 %v736_v41, %v1446_v35  ;;  %v772_v25 = vmul.f32 %v736_v41, %v1454_v54  ;;  %v777_v23 = vmul.f32 %v736_v41, %v1468_v61  ;;  %s1237_s30 = scalar_lea.vmem %s982_s29, 8192  ;;  %p1242_p0 = scmp.lt.s32.totalorder %s982_s29, %s982_s29 }
 0x19b   :  { %728 = vst [vmem:[#allocation10 + $0xb0] sm:$0xff] %v726_v13  ;;  %733 = vst [vmem:[#allocation10 + $0xb8] sm:$0xff] %v731_v9  ;;  %v757_v26 = vsub.f32 %v754_v17, %v548_v45  ;;  %v785_v27 = vmul.f32 %v1613_v42, %v1597_v22  ;;  %v790_v21 = vmul.f32 %v1613_v42, %v1413_v10  ;;  %p1238_p13 = scmp.ne.s32.totalorder %s982_s29, %s1237_s30  ;;  %p1243_p1 = scmp.lt.s32.totalorder %s1237_s30, %s1237_s30 }
 0x19c   :  { %741 = vst [vmem:[#allocation10 + $0xc0] sm:$0xff] %v739_v14  ;;  %708 = vst [vmem:[#allocation10 + $0x90] sm:$0xff] %v706_v15  ;;  %v795_v3 = vmul.f32 %v1613_v42, %v1417_v12  ;;  %v800_v28 = vmul.f32 %v1613_v42, %v1426_v20  ;;  %v805_v45 = vmul.f32 %v1613_v42, %v1434_v34 }
 0x19d   :  { %746 = vst [vmem:[#allocation10 + $0xc8] sm:$0xff] %v744_v16  ;;  %751 = vst [vmem:[#allocation10 + $0xd0] sm:$0xff] %v749_v1  ;;  %v813_v53 = vmul.f32 %v1613_v42, %v1446_v35  ;;  %v818_v52 = vmul.f32 %v1613_v42, %v1454_v54  ;;  %v823_v30 = vmul.f32 %v1613_v42, %v1468_v61  ;;  %p1244_p2 = por %p1243_p1, %p1242_p0 }
 0x19e   :  { %764 = vst [vmem:[#allocation10 + $0xe0] sm:$0xff] %v762_v24  ;;  %769 = vst [vmem:[#allocation10 + $0xe8] sm:$0xff] %v767_v19  ;;  %v831_v60 = vmul.f32 %v1616_v49, %v1597_v22  ;;  %v836_v31 = vmul.f32 %v1616_v49, %v1413_v10  ;;  %v841_v48 = vmul.f32 %v1616_v49, %v1417_v12 }
 0x19f   :  { %774 = vst [vmem:[#allocation10 + $0xf0] sm:$0xff] %v772_v25  ;;  %779 = vst [vmem:[#allocation10 + $0xf8] sm:$0xff] %v777_v23  ;;  %v808_v37 = vsub.f32 %v805_v45, %v558_v59  ;;  %v846_v38 = vmul.f32 %v1616_v49, %v1426_v20  ;;  %v851_v39 = vmul.f32 %v1616_v49, %v1434_v34  ;;  %p1245_p3 = pnand %p1244_p2, %p1238_p13 }
 0x1a0   :  { %759 = vst [vmem:[#allocation10 + $0xd8] sm:$0xff] %v757_v26  ;;  %787 = vst [vmem:[#allocation10 + $0x100] sm:$0xff] %v785_v27  ;;  %v856_v40 = vmul.f32 %v1616_v49, %v1446_v35  ;;  %v596_v41 = vmul.f32 %v1160_v32, %v1605_v36  ;;  %v864_v59 = vmul.f32 %v1616_v49, %v1454_v54 }
 0x1a1   :  { %792 = vst [vmem:[#allocation10 + $0x108] sm:$0xff] %v790_v21  ;;  %797 = vst [vmem:[#allocation10 + $0x110] sm:$0xff] %v795_v3  ;;  %v869_v42 = vmul.f32 %v1616_v49, %v1468_v61  ;;  %v874_v43 = vmul.f32 %v1594_v33, %v574_v18  ;;  %v920_v44 = vmul.f32 %v1594_v33, %v584_v11 }
 0x1a2   :  { %802 = vst [vmem:[#allocation10 + $0x118] sm:$0xff] %v800_v28  ;;  %815 = vst [vmem:[#allocation10 + $0x128] sm:$0xff] %v813_v53  ;;  %v859_v36 = vsub.f32 %v856_v40, %v568_v47  ;;  %v597_v50 = vsub.f32 2.0, %v596_v41 }
 0x1a3   :  { %820 = vst [vmem:[#allocation10 + $0x130] sm:$0xff] %v818_v52  ;;  %825 = vst [vmem:[#allocation10 + $0x138] sm:$0xff] %v823_v30  ;;  %v877_v51 = vmul.f32 %v874_v43, %v1597_v22  ;;  %v882_v49 = vmul.f32 %v874_v43, %v1413_v10  ;;  %v887_v2 = vmul.f32 %v874_v43, %v1417_v12 }
 0x1a4   :  { %833 = vst [vmem:[#allocation10 + $0x140] sm:$0xff] %v831_v60  ;;  %838 = vst [vmem:[#allocation10 + $0x148] sm:$0xff] %v836_v31  ;;  %v892_v18 = vmul.f32 %v874_v43, %v1426_v20  ;;  %v897_v29 = vmul.f32 %v874_v43, %v1434_v34  ;;  %v902_v47 = vmul.f32 %v874_v43, %v1446_v35 }
 0x1a5   :  { %843 = vst [vmem:[#allocation10 + $0x150] sm:$0xff] %v841_v48  ;;  %810 = vst [vmem:[#allocation10 + $0x120] sm:$0xff] %v808_v37  ;;  %v907_v55 = vmul.f32 %v874_v43, %v1454_v54  ;;  %v598_v11 = vmul.f32 %v1160_v32, %v597_v50  ;;  %v915_v33 = vmul.f32 %v874_v43, %v1468_v61 }
 0x1a6   :  { %848 = vst [vmem:[#allocation10 + $0x158] sm:$0xff] %v846_v38  ;;  %853 = vst [vmem:[#allocation10 + $0x160] sm:$0xff] %v851_v39  ;;  %v923_v56 = vmul.f32 %v920_v44, %v1597_v22  ;;  %v928_v57 = vmul.f32 %v920_v44, %v1413_v10  ;;  %v933_v5 = vmul.f32 %v920_v44, %v1417_v12 }
 0x1a7   :  { %866 = vst [vmem:[#allocation10 + $0x170] sm:$0xff] %v864_v59  ;;  %871 = vst [vmem:[#allocation10 + $0x178] sm:$0xff] %v869_v42  ;;  %v910_v62 = vsub.f32 %v907_v55, %v578_v6  ;;  %v938_v0 = vmul.f32 %v920_v44, %v1426_v20  ;;  %v943_v63 = vmul.f32 %v920_v44, %v1434_v34 }
 0x1a8   :  { %861 = vst [vmem:[#allocation10 + $0x168] sm:$0xff] %v859_v36  ;;  %879 = vst [vmem:[#allocation10 + $0x180] sm:$0xff] %v877_v51  ;;  %v601_v4 = vmul.f32 %v600_v46, %v598_v11  ;;  %v948_v8 = vmul.f32 %v920_v44, %v1446_v35  ;;  %v953_v58 = vmul.f32 %v920_v44, %v1454_v54 }
 0x1a9   :  { %884 = vst [vmem:[#allocation10 + $0x188] sm:$0xff] %v882_v49  ;;  %889 = vst [vmem:[#allocation10 + $0x190] sm:$0xff] %v887_v2  ;;  %v958_v13 = vmul.f32 %v920_v44, %v1468_v61 }
 0x1aa   :  { %894 = vst [vmem:[#allocation10 + $0x198] sm:$0xff] %v892_v18  ;;  %899 = vst [vmem:[#allocation10 + $0x1a0] sm:$0xff] %v897_v29  ;;  %v605_v6 = vmul.f32 %v1597_v22, %v601_v4  ;;  %v609_v9 = vmul.f32 %v601_v4, %v1413_v10  ;;  %v614_v14 = vmul.f32 %v601_v4, %v1417_v12 }
 0x1ab   :  { %904 = vst [vmem:[#allocation10 + $0x1a8] sm:$0xff] %v902_v47  ;;  %917 = vst [vmem:[#allocation10 + $0x1b8] sm:$0xff] %v915_v33  ;;  %v619_v15 = vmul.f32 %v601_v4, %v1426_v20  ;;  %v624_v16 = vmul.f32 %v601_v4, %v1434_v34  ;;  %v629_v1 = vmul.f32 %v601_v4, %v1446_v35 }
 0x1ac   :  { %925 = vst [vmem:[#allocation10 + $0x1c0] sm:$0xff] %v923_v56  ;;  %930 = vst [vmem:[#allocation10 + $0x1c8] sm:$0xff] %v928_v57  ;;  %v634_v17 = vmul.f32 %v601_v4, %v1454_v54  ;;  %v639_v24 = vmul.f32 %v601_v4, %v1468_v61  ;;  %v961_v10 = vsub.f32 %v958_v13, %v588_v7 }
 0x1ad   :  { %912 = vst [vmem:[#allocation10 + $0x1b0] sm:$0xff] %v910_v62  ;;  %935 = vst [vmem:[#allocation10 + $0x1d0] sm:$0xff] %v933_v5 }
 0x1ae   :  { %940 = vst [vmem:[#allocation10 + $0x1d8] sm:$0xff] %v938_v0  ;;  %945 = vst [vmem:[#allocation10 + $0x1e0] sm:$0xff] %v943_v63 }
 0x1af   :  { %950 = vst [vmem:[#allocation10 + $0x1e8] sm:$0xff] %v948_v8  ;;  %955 = vst [vmem:[#allocation10 + $0x1f0] sm:$0xff] %v953_v58 }
 0x1b0   :  { %606 = vst [vmem:[#allocation10] sm:$0xff] %v605_v6  ;;  %611 = vst [vmem:[#allocation10 + $0x8] sm:$0xff] %v609_v9 }
 0x1b1   :  { %616 = vst [vmem:[#allocation10 + $0x10] sm:$0xff] %v614_v14  ;;  %621 = vst [vmem:[#allocation10 + $0x18] sm:$0xff] %v619_v15 }
 0x1b2   :  { %626 = vst [vmem:[#allocation10 + $0x20] sm:$0xff] %v624_v16  ;;  %631 = vst [vmem:[#allocation10 + $0x28] sm:$0xff] %v629_v1 }
 0x1b3   :  { %636 = vst [vmem:[#allocation10 + $0x30] sm:$0xff] %v634_v17  ;;  %641 = vst [vmem:[#allocation10 + $0x38] sm:$0xff] %v639_v24 }
 0x1b4   :  { %963 = vst [vmem:[#allocation10 + $0x1f8] sm:$0xff] %v961_v10 }
 0x1b5   :  { %1248 = shalt.err (!%p1245_p3)
}
 0x1b6   :  { %s1249_s7 = scalar_lea.hbm %s1762_s4, 8192 }
 0x1b7   :  { %p1250_p4 = scmp.ne.s32.totalorder %s1762_s4, %s1249_s7  ;;  %p1253_p5 = scmp.lt.u32.totalorder %s1249_s7, %s1762_s4 }
 0x1b9   :  { %p1255_p6 = pnand %p1253_p5, %p1250_p4 }
 0x1bb   :  { %1258 = shalt.err (!%p1255_p6)
}
 0x1bc   :  { %987 = dma.vmem_to_hbm [thread:$0]  %s982_s29, 8192, %s1762_s4, [#allocation11], %s1272_s1, %s1272_s1, %s1273_s20  }
 0x1bd   :  { %1265 = dma.done.wait [#allocation4], 1024  }
 0x1be   :  { %1266 = vsyncadd [#allocation4], 4294966272 }
 0x1bf   :  { %1267 = dma.done.wait [#allocation11], 8192  }
 0x1c0   :  { %1268 = vsyncadd [#allocation11], 4294959104 }
 0x1c1   :  { %994 = vsyncpa [#allocation3], 1 }
 0x1c2   :  { %995 = vsyncpa [#allocation8], 1 }
 0x1c3   :  { %996 = vsyncpa [#allocation4], 1 }
 0x1c4   :  { %997 = vsyncpa [#allocation11], 1 }
 0x1c5   :  { %998 = vsyncpa [#allocation5], 1 }

</bundles_post_ra>
